<compile_context>
chip_gen: v7x
topology: tpu7x:2x2x1
jax: 0.10.0
libtpu: 0.0.40
codegen_flags: <defaults>
</compile_context>

<pallas_src>
import functools

import jax
import jax.numpy as jnp
from jax.experimental import pallas as pl
from jax.experimental.pallas import tpu as pltpu


# ----------------------------------------------------------------------------
# small helpers
# ----------------------------------------------------------------------------
def _round_up(x, m):
    return ((x + m - 1) // m) * m


def _pad2(a, rows, cols):
    return jnp.pad(a, ((0, rows - a.shape[0]), (0, cols - a.shape[1])))


def _vmem_capacity_bytes():
    """Physical per-core VMEM (64 MiB on v7x, 128 MiB on v5e/v6e)."""
    try:
        cap = getattr(pltpu.get_tpu_info(), "vmem_capacity_bytes", None)
        if cap:
            return int(cap)
    except Exception:
        pass
    return 64 * 1024 * 1024          # conservative default (v7x per-core)


def _gcn_vmem_estimate(n_pad, f_pad, h_pad, b_sz, tile):
    lanes_f = b_sz * f_pad
    lanes_h = b_sz * h_pad
    return (2 * tile * tile * 2                     # adjacency tile (bf16, 2-buffered)
            + 2 * tile * lanes_f * 4                # X block
            + 2 * (f_pad * h_pad + h_pad * h_pad) * 4  # W1, W2
            + 4 * 8 * lanes_h * 4                   # biases (sublane-padded)
            + 2 * tile * lanes_h * 4                # output block
            + n_pad * lanes_h * 4                   # persistent S scratch (f32)
            + tile * lanes_h * 2                    # per-k RHS tile (bf16)
            + tile * lanes_h * 4)                   # layer-1 accumulator (f32)


def _pick_tile(n_pad, f_pad, h_pad, b_sz, budget):
    """Largest tile bounded by VMEM (not MXU width): bigger tiles amortize the
    ~0.35us per-grid-step overhead, especially on v5e."""
    for t in (512, 256, 128):
        if n_pad % t == 0 and _gcn_vmem_estimate(n_pad, f_pad, h_pad, b_sz, t) <= budget:
            return t
    return 128


# ----------------------------------------------------------------------------
# Fused 2-layer GCN encoder kernel, batch concatenated along lanes.
# grid = (layer l, a, b):
#   layer 0 (a = contraction tile k, b = row tile m):
#       S[m] (+)= A[m,k] @ (X[k] @ W1)          (per-k RHS tile cached in bf16)
#       epilogue (last k): S[m] <- relu(S[m]+b1) @ W2      (layer-1 RHS, VMEM)
#   layer 1 (a = row tile m, b = contraction tile k):
#       acc (+)= A[m,k] @ S[k] ;  finalize: OUT[m] = acc + b2
# ----------------------------------------------------------------------------
def _gcn2_kernel(adj_ref, x_ref, w1_ref, b1_ref, w2_ref, b2_ref, out_ref,
                 s_ref, rhsk_ref, acc_ref, *, n_batch, f_pad, h_pad, tile):
    l = pl.program_id(0)
    a = pl.program_id(1)
    b = pl.program_id(2)
    nt = pl.num_programs(1)

    # ------------------------------ layer 0 ---------------------------------
    @pl.when(l == 0)
    def _layer0():
        @pl.when(b == 0)                       # build the per-k RHS tile once
        def _build_rhs():
            for nb in range(n_batch):
                xk = x_ref[:, nb * f_pad:(nb + 1) * f_pad]
                r = jnp.dot(xk, w1_ref[...], preferred_element_type=jnp.float32)
                rhsk_ref[:, nb * h_pad:(nb + 1) * h_pad] = r.astype(jnp.bfloat16)

        contrib = jnp.dot(adj_ref[...], rhsk_ref[...],
                          preferred_element_type=jnp.float32)
        ms = pl.ds(pl.multiple_of(b * tile, tile), tile)

        @pl.when(a == 0)
        def _init():
            s_ref[ms, :] = contrib

        @pl.when(a > 0)
        def _accum():
            s_ref[ms, :] = s_ref[ms, :] + contrib

        @pl.when(a == nt - 1)                  # fused layer-0 epilogue
        def _epilogue():
            h1 = jnp.maximum(s_ref[ms, :] + b1_ref[...], 0.0)
            for nb in range(n_batch):
                cs = pl.ds(nb * h_pad, h_pad)
                s_ref[ms, cs] = jnp.dot(h1[:, nb * h_pad:(nb + 1) * h_pad],
                                        w2_ref[...],
                                        preferred_element_type=jnp.float32)

    # ------------------------------ layer 1 ---------------------------------
    @pl.when(l == 1)
    def _layer1():
        ks = pl.ds(pl.multiple_of(b * tile, tile), tile)
        contrib = jnp.dot(adj_ref[...], s_ref[ks, :].astype(jnp.bfloat16),
                          preferred_element_type=jnp.float32)

        @pl.when(b == 0)
        def _init():
            acc_ref[...] = contrib

        @pl.when(b > 0)
        def _accum():
            acc_ref[...] = acc_ref[...] + contrib

        @pl.when(b == nt - 1)
        def _finalize():
            out_ref[...] = acc_ref[...] + b2_ref[...]


def gcn2_fused(adj_bf16, x_cat, w1, b1t, w2, b2t, *, b_sz, tile):
    """adj_bf16: (Np,Np) bf16; x_cat: (Np, B*Fp) f32; biases lane-tiled to B*Hp."""
    n_pad = adj_bf16.shape[0]
    f_pad = x_cat.shape[1] // b_sz
    h_pad = w1.shape[1]
    nt = n_pad // tile
    lanes_f = b_sz * f_pad
    lanes_h = b_sz * h_pad

    flops = int(b_sz * (2 * n_pad * f_pad * h_pad            # X @ W1
                        + 2 * n_pad * h_pad * h_pad          # H1 @ W2
                        + 2 * 2 * n_pad * n_pad * h_pad))    # two A @ (.)
    bytes_acc = int(2 * 2 * n_pad * n_pad                    # adjacency (bf16) x2 layers
                    + 4 * (n_pad * lanes_f
                           + f_pad * h_pad + h_pad * h_pad + 2 * lanes_h
                           + n_pad * lanes_h))               # single output slab

    cap = _vmem_capacity_bytes()
    budget = cap - 8 * 1024 * 1024
    est = _gcn_vmem_estimate(n_pad, f_pad, h_pad, b_sz, tile)
    # TODO(synk): spill the full-N scratch to HBM (two-pass pipeline) for graphs
    # whose persistent VMEM footprint exceeds the per-core budget.
    assert est <= budget, "graph too large for the fused single-scratch kernel"
    vmem_limit = int(min(max(int(1.25 * est), 32 * 1024 * 1024), budget))

    return pl.pallas_call(
        functools.partial(_gcn2_kernel, n_batch=b_sz, f_pad=f_pad,
                          h_pad=h_pad, tile=tile),
        out_shape=jax.ShapeDtypeStruct((n_pad, lanes_h), jnp.float32),
        grid_spec=pltpu.PrefetchScalarGridSpec(
            num_scalar_prefetch=0,
            grid=(2, nt, nt),
            in_specs=[
                # adjacency: (row,col) = (b,a) for layer 0, (a,b) for layer 1
                pl.BlockSpec((tile, tile),
                             lambda l, a, b: (b + (a - b) * l, a + (b - a) * l)),
                # X: one fetch per contraction tile in layer 0, pinned afterwards
                pl.BlockSpec((tile, lanes_f),
                             lambda l, a, b: (a * (1 - l) + (nt - 1) * l, 0)),
                pl.BlockSpec((f_pad, h_pad), lambda l, a, b: (0, 0)),   # W1
                pl.BlockSpec((1, lanes_h), lambda l, a, b: (0, 0)),     # b1 (lane-tiled)
                pl.BlockSpec((h_pad, h_pad), lambda l, a, b: (0, 0)),   # W2
                pl.BlockSpec((1, lanes_h), lambda l, a, b: (0, 0)),     # b2 (lane-tiled)
            ],
            out_specs=pl.BlockSpec((tile, lanes_h), lambda l, a, b: (a * l, 0)),
            scratch_shapes=[
                pltpu.VMEM((n_pad, lanes_h), jnp.float32),   # S: acc -> layer-1 RHS
                pltpu.VMEM((tile, lanes_h), jnp.bfloat16),   # per-k RHS tile
                pltpu.VMEM((tile, lanes_h), jnp.float32),    # layer-1 accumulator
            ],
        ),
        compiler_params=pltpu.CompilerParams(
            # layer 1 reads VMEM state produced by every layer-0 step, so all
            # grid axes must stay sequential on one core (no megacore split).
            dimension_semantics=("arbitrary", "arbitrary", "arbitrary"),
            vmem_limit_bytes=vmem_limit,
        ),
        cost_estimate=pl.CostEstimate(
            flops=flops, transcendentals=0, bytes_accessed=bytes_acc),
    )(adj_bf16, x_cat, w1, b1t, w2, b2t)


# ----------------------------------------------------------------------------
# Projection head kernel: fc2(elu(fc1(z)))  — row-tiled, weights resident.
# ----------------------------------------------------------------------------
def _project_kernel(z_ref, w1_ref, b1_ref, w2_ref, b2_ref, out_ref):
    h = jnp.dot(z_ref[...], w1_ref[...],
                preferred_element_type=jnp.float32) + b1_ref[...]
    # ELU(alpha=1); min() keeps exp() from overflowing on the discarded branch.
    h = jnp.where(h > 0.0, h, jnp.exp(jnp.minimum(h, 0.0)) - 1.0)
    out_ref[...] = jnp.dot(h, w2_ref[...],
                           preferred_element_type=jnp.float32) + b2_ref[...]


def project(z, params):
    """Encoder.project: fc1 -> ELU -> fc2 (Pallas, padded to 128 lanes)."""
    n, hidden = z.shape
    h_log, p_log = params["fc1_w"].shape
    n_pad = _round_up(n, 128)
    h_pad = _round_up(hidden, 128)
    p_pad = _round_up(p_log, 128)
    tm = 256 if n_pad % 256 == 0 else 128

    z_p = _pad2(z.astype(jnp.float32), n_pad, h_pad)
    w1 = _pad2(params["fc1_w"], h_pad, p_pad)
    b1 = _pad2(params["fc1_b"].reshape(1, -1), 1, p_pad)
    w2 = _pad2(params["fc2_w"], p_pad, h_pad)
    b2 = _pad2(params["fc2_b"].reshape(1, -1), 1, h_pad)

    out = pl.pallas_call(
        _project_kernel,
        out_shape=jax.ShapeDtypeStruct((n_pad, h_pad), jnp.float32),
        grid_spec=pltpu.PrefetchScalarGridSpec(
            num_scalar_prefetch=0,
            grid=(n_pad // tm,),
            in_specs=[
                pl.BlockSpec((tm, h_pad), lambda i: (i, 0)),
                pl.BlockSpec((h_pad, p_pad), lambda i: (0, 0)),
                pl.BlockSpec((1, p_pad), lambda i: (0, 0)),
                pl.BlockSpec((p_pad, h_pad), lambda i: (0, 0)),
                pl.BlockSpec((1, h_pad), lambda i: (0, 0)),
            ],
            out_specs=pl.BlockSpec((tm, h_pad), lambda i: (i, 0)),
        ),
        compiler_params=pltpu.CompilerParams(
            dimension_semantics=("parallel",),
            vmem_limit_bytes=32 * 1024 * 1024,
        ),
        cost_estimate=pl.CostEstimate(
            flops=int(4 * n_pad * h_pad * p_pad),
            transcendentals=int(n_pad * p_pad),
            bytes_accessed=int(4 * (2 * n_pad * h_pad + 2 * h_pad * p_pad
                                    + p_pad + h_pad))),
    )(z_p, w1, b1, w2, b2)
    return out[:n, :hidden]


# ----------------------------------------------------------------------------
# Glue: graph preprocessing, augmentors, batched GCN encoder, parameters
# ----------------------------------------------------------------------------
def build_norm_adj(edge_index, edge_weight, num_nodes):
    """Dense GCN-normalized adjacency  D^-1/2 (A + I) D^-1/2 (JAX scatter)."""
    src, dst = edge_index[0], edge_index[1]
    a = jnp.zeros((num_nodes, num_nodes), jnp.float32)
    a = a.at[dst, src].add(edge_weight.astype(jnp.float32))
    a = a + jnp.eye(num_nodes, dtype=jnp.float32)            # self-loops
    deg = a.sum(axis=1)
    d_inv_sqrt = jnp.where(deg > 0, 1.0 / jnp.sqrt(deg), 0.0)
    return d_inv_sqrt[:, None] * a * d_inv_sqrt[None, :]


def feature_mask_aug(x, edge_index, edge_weight, key, drop_prob=0.3):
    """aug1: randomly zero feature columns (edges unchanged)."""
    mask = jax.random.bernoulli(key, 1.0 - drop_prob, (x.shape[1],)).astype(x.dtype)
    return x * mask[None, :], edge_index, edge_weight


def edge_drop_aug(x, edge_index, edge_weight, key, drop_prob=0.3):
    """aug2: randomly drop edges by zeroing their weights."""
    keep = jax.random.bernoulli(key, 1.0 - drop_prob, edge_weight.shape)
    return x, edge_index, edge_weight * keep.astype(edge_weight.dtype)


def gcn_encoder_batched(adj, x_batch, params):
    """2-layer GCN for a batch of feature matrices sharing one adjacency.
    The batch is concatenated along lanes so each adjacency-tile matmul fills
    B*128 MXU columns in a single dot."""
    b_sz, n, f = x_batch.shape
    hidden = params["gcn1_w"].shape[1]
    n_pad = _round_up(n, 128)
    f_pad = _round_up(f, 128)
    h_pad = _round_up(hidden, 128)

    budget = _vmem_capacity_bytes() - 8 * 1024 * 1024
    tile = _pick_tile(n_pad, f_pad, h_pad, b_sz, budget)

    adj_bf16 = _pad2(adj, n_pad, n_pad).astype(jnp.bfloat16)   # halves HBM stream
    x_cat = jnp.concatenate(
        [_pad2(x_batch[i].astype(jnp.float32), n_pad, f_pad) for i in range(b_sz)],
        axis=1)
    w1 = _pad2(params["gcn1_w"], f_pad, h_pad)
    w2 = _pad2(params["gcn2_w"], h_pad, h_pad)
    b1t = jnp.tile(_pad2(params["gcn1_b"].reshape(1, -1), 1, h_pad), (1, b_sz))
    b2t = jnp.tile(_pad2(params["gcn2_b"].reshape(1, -1), 1, h_pad), (1, b_sz))

    out = gcn2_fused(adj_bf16, x_cat, w1, b1t, w2, b2t, b_sz=b_sz, tile=tile)
    return jnp.stack(
        [out[:n, i * h_pad:i * h_pad + hidden] for i in range(b_sz)], axis=0)


def init_params(key, in_dim, hidden_dim, proj_dim):
    """Deterministic init (PyTorch-Linear-style uniform bounds)."""
    def linear(k, fan_in, fan_out):
        kw, kb = jax.random.split(k)
        bound = 1.0 / jnp.sqrt(fan_in)
        w = jax.random.uniform(kw, (fan_in, fan_out), jnp.float32, -bound, bound)
        b = jax.random.uniform(kb, (fan_out,), jnp.float32, -bound, bound)
        return w, b

    k1, k2, k3, k4 = jax.random.split(key, 4)
    g1w, g1b = linear(k1, in_dim, hidden_dim)
    g2w, g2b = linear(k2, hidden_dim, hidden_dim)
    f1w, f1b = linear(k3, hidden_dim, proj_dim)
    f2w, f2b = linear(k4, proj_dim, hidden_dim)
    return {"gcn1_w": g1w, "gcn1_b": g1b, "gcn2_w": g2w, "gcn2_b": g2b,
            "fc1_w": f1w, "fc1_b": f1b, "fc2_w": f2w, "fc2_b": f2b}


def encoder_forward(x, edge_index, edge_weight, params, key1, key2):
    """Mirrors Encoder.forward: returns (z, z1, z2)."""
    n = x.shape[0]
    ew = edge_weight.astype(jnp.float32)

    x1, _, _ = feature_mask_aug(x, edge_index, ew, key1)     # edges unchanged
    x2, _, ew2 = edge_drop_aug(x, edge_index, ew, key2)

    # z and z1 share the same graph -> build the normalized adjacency once and
    # run both passes batched through one fused kernel call (adjacency tiles
    # are streamed once per reuse).  z2 has dropped edges -> its own adjacency.
    adj = build_norm_adj(edge_index, ew, n)
    adj2 = build_norm_adj(edge_index, ew2, n)

    zz1 = gcn_encoder_batched(adj, jnp.stack([x, x1], axis=0), params)
    z2 = gcn_encoder_batched(adj2, x2[None], params)[0]
    return zz1[0], zz1[1], z2


# ----------------------------------------------------------------------------
if __name__ == "__main__":
    N_NODES, IN_DIM, HIDDEN_DIM, PROJ_DIM, N_EDGES = 16, 8, 32, 16, 40

    root = jax.random.PRNGKey(0)
    k_x, k_src, k_dst, k_w, k_params, k_aug1, k_aug2 = jax.random.split(root, 7)

    x = jax.random.normal(k_x, (N_NODES, IN_DIM), jnp.float32)
    edge_index = jnp.stack(
        [jax.random.randint(k_src, (N_EDGES,), 0, N_NODES),
         jax.random.randint(k_dst, (N_EDGES,), 0, N_NODES)], axis=0)
    edge_weight = jax.random.uniform(k_w, (N_EDGES,), jnp.float32, 0.1, 1.0)

    params = init_params(k_params, IN_DIM, HIDDEN_DIM, PROJ_DIM)

    fwd = jax.jit(encoder_forward)
    z, z1, z2 = fwd(x, edge_index, edge_weight, params, k_aug1, k_aug2)
    p = jax.jit(project)(z, params)
    jax.block_until_ready((z, z1, z2, p))

    assert z.shape == (N_NODES, HIDDEN_DIM)
    assert z1.shape == (N_NODES, HIDDEN_DIM)
    assert z2.shape == (N_NODES, HIDDEN_DIM)
    assert p.shape == (N_NODES, HIDDEN_DIM)

    # Pure-JAX reference check (same deterministic augmentation keys).
    # Tolerance covers the bf16 adjacency / RHS operands used on the MXU.
    ew = edge_weight.astype(jnp.float32)
    x1_r, _, _ = feature_mask_aug(x, edge_index, ew, k_aug1)
    x2_r, _, ew2_r = edge_drop_aug(x, edge_index, ew, k_aug2)
    adj_r = build_norm_adj(edge_index, ew, N_NODES)
    adj2_r = build_norm_adj(edge_index, ew2_r, N_NODES)

    def ref_gcn(a, xx):
        h = jnp.maximum(a @ xx @ params["gcn1_w"] + params["gcn1_b"], 0.0)
        return a @ h @ params["gcn2_w"] + params["gcn2_b"]

    def ref_proj(zz):
        h = zz @ params["fc1_w"] + params["fc1_b"]
        h = jnp.where(h > 0, h, jnp.exp(jnp.minimum(h, 0.0)) - 1.0)
        return h @ params["fc2_w"] + params["fc2_b"]

    checks = [(z, ref_gcn(adj_r, x)), (z1, ref_gcn(adj_r, x1_r)),
              (z2, ref_gcn(adj2_r, x2_r)), (p, ref_proj(ref_gcn(adj_r, x)))]
    for got, want in checks:
        err = float(jnp.max(jnp.abs(got - want)))
        assert err < 5e-2, f"mismatch vs reference: max abs err {err}"

    print("KERNEL_OK")
</pallas_src>

<mosaic_0001>
module attributes {stable_mosaic.version = 11 : i64} {
  func.func @_gcn2_kernel(%arg0: i32, %arg1: i32, %arg2: i32, %arg3: memref<128x128xbf16, #tpu.memory_space<vmem>>, %arg4: memref<128x256xf32, #tpu.memory_space<vmem>>, %arg5: memref<128x128xf32, #tpu.memory_space<vmem>>, %arg6: memref<1x256xf32, #tpu.memory_space<vmem>>, %arg7: memref<128x128xf32, #tpu.memory_space<vmem>>, %arg8: memref<1x256xf32, #tpu.memory_space<vmem>>, %arg9: memref<128x256xf32, #tpu.memory_space<vmem>>, %arg10: memref<128x256xf32, #tpu.memory_space<vmem>>, %arg11: memref<128x256xbf16, #tpu.memory_space<vmem>>, %arg12: memref<128x256xf32, #tpu.memory_space<vmem>>) attributes {dimension_semantics = [#tpu.dimension_semantics<arbitrary>, #tpu.dimension_semantics<arbitrary>, #tpu.dimension_semantics<arbitrary>], iteration_bounds = array<i64: 2, 1, 1>, scalar_prefetch = 0 : i64, scratch_operands = 3 : i64, tpu.core_type = #tpu.core_type<tc>, window_params = [{transform_indices = @transform_0, window_bounds = array<i64: 128, 128>}, {transform_indices = @transform_1, window_bounds = array<i64: 128, 256>}, {pipeline_mode = #tpu.pipeline_mode<synchronous>, transform_indices = @transform_2, window_bounds = array<i64: 128, 128>}, {pipeline_mode = #tpu.pipeline_mode<synchronous>, transform_indices = @transform_3, window_bounds = array<i64: 1, 256>}, {pipeline_mode = #tpu.pipeline_mode<synchronous>, transform_indices = @transform_4, window_bounds = array<i64: 128, 128>}, {pipeline_mode = #tpu.pipeline_mode<synchronous>, transform_indices = @transform_5, window_bounds = array<i64: 1, 256>}, {transform_indices = @transform_6, window_bounds = array<i64: 128, 256>}]} {
    %c0_i32 = arith.constant 0 : i32
    %0 = arith.cmpi eq, %arg0, %c0_i32 : i32
    %1 = arith.extui %0 : i1 to i32
    %c0_i32_0 = arith.constant 0 : i32
    %2 = arith.cmpi ne, %1, %c0_i32_0 : i32
    scf.if %2 {
      %c0_i32_2 = arith.constant 0 : i32
      %6 = arith.cmpi eq, %arg2, %c0_i32_2 : i32
      %7 = arith.extui %6 : i1 to i32
      %c0_i32_3 = arith.constant 0 : i32
      %8 = arith.cmpi ne, %7, %c0_i32_3 : i32
      scf.if %8 {
        %c0_13 = arith.constant 0 : index
        %c0_14 = arith.constant 0 : index
        %23 = vector.load %arg4[%c0_13, %c0_14] : memref<128x256xf32, #tpu.memory_space<vmem>>, vector<128x128xf32>
        %c0_15 = arith.constant 0 : index
        %c0_16 = arith.constant 0 : index
        %24 = vector.load %arg5[%c0_15, %c0_16] : memref<128x128xf32, #tpu.memory_space<vmem>>, vector<128x128xf32>
        %cst_17 = arith.constant dense<0.000000e+00> : vector<128x128xf32>
        %25 = tpu.matmul %23, %24, %cst_17 {dimension_numbers = #tpu.dot_dimension_numbers<[1], [0], [0], [1], [0, 0, 1, 1], [], []>} : vector<128x128xf32>, vector<128x128xf32>, vector<128x128xf32> -> vector<128x128xf32>
        %26 = arith.truncf %25 : vector<128x128xf32> to vector<128x128xbf16>
        %c0_18 = arith.constant 0 : index
        %c0_19 = arith.constant 0 : index
        %27 = vector.load %arg11[%c0_18, %c0_19] : memref<128x256xbf16, #tpu.memory_space<vmem>>, vector<128x128xbf16>
        tpu.vector_store %arg11[%c0_18, %c0_19], %26 {strides = array<i32>} : memref<128x256xbf16, #tpu.memory_space<vmem>>, vector<128x128xbf16>,
        %c0_20 = arith.constant 0 : index
        %c128 = arith.constant 128 : index
        %28 = vector.load %arg4[%c0_20, %c128] : memref<128x256xf32, #tpu.memory_space<vmem>>, vector<128x128xf32>
        %c0_21 = arith.constant 0 : index
        %c0_22 = arith.constant 0 : index
        %29 = vector.load %arg5[%c0_21, %c0_22] : memref<128x128xf32, #tpu.memory_space<vmem>>, vector<128x128xf32>
        %cst_23 = arith.constant dense<0.000000e+00> : vector<128x128xf32>
        %30 = tpu.matmul %28, %29, %cst_23 {dimension_numbers = #tpu.dot_dimension_numbers<[1], [0], [0], [1], [0, 0, 1, 1], [], []>} : vector<128x128xf32>, vector<128x128xf32>, vector<128x128xf32> -> vector<128x128xf32>
        %31 = arith.truncf %30 : vector<128x128xf32> to vector<128x128xbf16>
        %c0_24 = arith.constant 0 : index
        %c128_25 = arith.constant 128 : index
        %32 = vector.load %arg11[%c0_24, %c128_25] : memref<128x256xbf16, #tpu.memory_space<vmem>>, vector<128x128xbf16>
        tpu.vector_store %arg11[%c0_24, %c128_25], %31 {strides = array<i32>} : memref<128x256xbf16, #tpu.memory_space<vmem>>, vector<128x128xbf16>,
      } else {
      }
      %c0 = arith.constant 0 : index
      %c0_4 = arith.constant 0 : index
      %9 = vector.load %arg3[%c0, %c0_4] : memref<128x128xbf16, #tpu.memory_space<vmem>>, vector<128x128xbf16>
      %c0_5 = arith.constant 0 : index
      %c0_6 = arith.constant 0 : index
      %10 = vector.load %arg11[%c0_5, %c0_6] : memref<128x256xbf16, #tpu.memory_space<vmem>>, vector<128x256xbf16>
      %cst = arith.constant dense<0.000000e+00> : vector<128x256xf32>
      %11 = tpu.matmul %9, %10, %cst {dimension_numbers = #tpu.dot_dimension_numbers<[1], [0], [0], [1], [0, 0, 1, 1], [], []>} : vector<128x128xbf16>, vector<128x256xbf16>, vector<128x256xf32> -> vector<128x256xf32>
      %c128_i32 = arith.constant 128 : i32
      %12 = arith.muli %arg2, %c128_i32 : i32
      %13 = tpu.assume_multiple %12, 128 : i32
      %c0_i32_7 = arith.constant 0 : i32
      %14 = arith.cmpi eq, %arg1, %c0_i32_7 : i32
      %15 = arith.extui %14 : i1 to i32
      %c0_i32_8 = arith.constant 0 : i32
      %16 = arith.cmpi ne, %15, %c0_i32_8 : i32
      scf.if %16 {
        %23 = arith.index_cast %13 : i32 to index
        %c0_13 = arith.constant 0 : index
        %24 = vector.load %arg10[%23, %c0_13] : memref<128x256xf32, #tpu.memory_space<vmem>>, vector<128x256xf32>
        tpu.vector_store %arg10[%23, %c0_13], %11 {strides = array<i32>} : memref<128x256xf32, #tpu.memory_space<vmem>>, vector<128x256xf32>,
      } else {
      }
      %c0_i32_9 = arith.constant 0 : i32
      %17 = arith.cmpi sgt, %arg1, %c0_i32_9 : i32
      %18 = arith.extui %17 : i1 to i32
      %c0_i32_10 = arith.constant 0 : i32
      %19 = arith.cmpi ne, %18, %c0_i32_10 : i32
      scf.if %19 {
        %23 = arith.index_cast %13 : i32 to index
        %c0_13 = arith.constant 0 : index
        %24 = vector.load %arg10[%23, %c0_13] : memref<128x256xf32, #tpu.memory_space<vmem>>, vector<128x256xf32>
        %25 = arith.addf %24, %11 : vector<128x256xf32>
        %26 = arith.index_cast %13 : i32 to index
        %c0_14 = arith.constant 0 : index
        %27 = vector.load %arg10[%26, %c0_14] : memref<128x256xf32, #tpu.memory_space<vmem>>, vector<128x256xf32>
        tpu.vector_store %arg10[%26, %c0_14], %25 {strides = array<i32>} : memref<128x256xf32, #tpu.memory_space<vmem>>, vector<128x256xf32>,
      } else {
      }
      %c0_i32_11 = arith.constant 0 : i32
      %20 = arith.cmpi eq, %arg1, %c0_i32_11 : i32
      %21 = arith.extui %20 : i1 to i32
      %c0_i32_12 = arith.constant 0 : i32
      %22 = arith.cmpi ne, %21, %c0_i32_12 : i32
      scf.if %22 {
        %23 = arith.index_cast %13 : i32 to index
        %c0_13 = arith.constant 0 : index
        %24 = vector.load %arg10[%23, %c0_13] : memref<128x256xf32, #tpu.memory_space<vmem>>, vector<128x256xf32>
        %c0_14 = arith.constant 0 : index
        %c0_15 = arith.constant 0 : index
        %25 = vector.load %arg6[%c0_14, %c0_15] : memref<1x256xf32, #tpu.memory_space<vmem>>, vector<1x256xf32>
        %26 = vector.broadcast %25 : vector<1x256xf32> to vector<128x256xf32>
        %27 = arith.addf %24, %26 : vector<128x256xf32>
        %cst_16 = arith.constant 0.000000e+00 : f32
        %28 = vector.broadcast %cst_16 : f32 to vector<128x256xf32>
        %29 = arith.maximumf %27, %28 : vector<128x256xf32>
        %30 = vector.extract_strided_slice %29 {offsets = [0, 0], sizes = [128, 128], strides = [1, 1]} : vector<128x256xf32> to vector<128x128xf32>
        %c0_17 = arith.constant 0 : index
        %c0_18 = arith.constant 0 : index
        %31 = vector.load %arg7[%c0_17, %c0_18] : memref<128x128xf32, #tpu.memory_space<vmem>>, vector<128x128xf32>
        %cst_19 = arith.constant dense<0.000000e+00> : vector<128x128xf32>
        %32 = tpu.matmul %30, %31, %cst_19 {dimension_numbers = #tpu.dot_dimension_numbers<[1], [0], [0], [1], [0, 0, 1, 1], [], []>} : vector<128x128xf32>, vector<128x128xf32>, vector<128x128xf32> -> vector<128x128xf32>
        %33 = arith.index_cast %13 : i32 to index
        %c0_20 = arith.constant 0 : index
        %34 = vector.load %arg10[%33, %c0_20] : memref<128x256xf32, #tpu.memory_space<vmem>>, vector<128x128xf32>
        tpu.vector_store %arg10[%33, %c0_20], %32 {strides = array<i32>} : memref<128x256xf32, #tpu.memory_space<vmem>>, vector<128x128xf32>,
        %35 = vector.extract_strided_slice %29 {offsets = [0, 128], sizes = [128, 128], strides = [1, 1]} : vector<128x256xf32> to vector<128x128xf32>
        %c0_21 = arith.constant 0 : index
        %c0_22 = arith.constant 0 : index
        %36 = vector.load %arg7[%c0_21, %c0_22] : memref<128x128xf32, #tpu.memory_space<vmem>>, vector<128x128xf32>
        %cst_23 = arith.constant dense<0.000000e+00> : vector<128x128xf32>
        %37 = tpu.matmul %35, %36, %cst_23 {dimension_numbers = #tpu.dot_dimension_numbers<[1], [0], [0], [1], [0, 0, 1, 1], [], []>} : vector<128x128xf32>, vector<128x128xf32>, vector<128x128xf32> -> vector<128x128xf32>
        %38 = arith.index_cast %13 : i32 to index
        %c128 = arith.constant 128 : index
        %39 = vector.load %arg10[%38, %c128] : memref<128x256xf32, #tpu.memory_space<vmem>>, vector<128x128xf32>
        tpu.vector_store %arg10[%38, %c128], %37 {strides = array<i32>} : memref<128x256xf32, #tpu.memory_space<vmem>>, vector<128x128xf32>,
      } else {
      }
    } else {
    }
    %c1_i32 = arith.constant 1 : i32
    %3 = arith.cmpi eq, %arg0, %c1_i32 : i32
    %4 = arith.extui %3 : i1 to i32
    %c0_i32_1 = arith.constant 0 : i32
    %5 = arith.cmpi ne, %4, %c0_i32_1 : i32
    scf.if %5 {
      %c128_i32 = arith.constant 128 : i32
      %6 = arith.muli %arg2, %c128_i32 : i32
      %7 = tpu.assume_multiple %6, 128 : i32
      %c0 = arith.constant 0 : index
      %c0_2 = arith.constant 0 : index
      %8 = vector.load %arg3[%c0, %c0_2] : memref<128x128xbf16, #tpu.memory_space<vmem>>, vector<128x128xbf16>
      %9 = arith.index_cast %7 : i32 to index
      %c0_3 = arith.constant 0 : index
      %10 = vector.load %arg10[%9, %c0_3] : memref<128x256xf32, #tpu.memory_space<vmem>>, vector<128x256xf32>
      %11 = arith.truncf %10 : vector<128x256xf32> to vector<128x256xbf16>
      %cst = arith.constant dense<0.000000e+00> : vector<128x256xf32>
      %12 = tpu.matmul %8, %11, %cst {dimension_numbers = #tpu.dot_dimension_numbers<[1], [0], [0], [1], [0, 0, 1, 1], [], []>} : vector<128x128xbf16>, vector<128x256xbf16>, vector<128x256xf32> -> vector<128x256xf32>
      %c0_i32_4 = arith.constant 0 : i32
      %13 = arith.cmpi eq, %arg2, %c0_i32_4 : i32
      %14 = arith.extui %13 : i1 to i32
      %c0_i32_5 = arith.constant 0 : i32
      %15 = arith.cmpi ne, %14, %c0_i32_5 : i32
      scf.if %15 {
        %c0_10 = arith.constant 0 : index
        %c0_11 = arith.constant 0 : index
        %22 = vector.load %arg12[%c0_10, %c0_11] : memref<128x256xf32, #tpu.memory_space<vmem>>, vector<128x256xf32>
        tpu.vector_store %arg12[%c0_10, %c0_11], %12 {strides = array<i32>} : memref<128x256xf32, #tpu.memory_space<vmem>>, vector<128x256xf32>,
      } else {
      }
      %c0_i32_6 = arith.constant 0 : i32
      %16 = arith.cmpi sgt, %arg2, %c0_i32_6 : i32
      %17 = arith.extui %16 : i1 to i32
      %c0_i32_7 = arith.constant 0 : i32
      %18 = arith.cmpi ne, %17, %c0_i32_7 : i32
      scf.if %18 {
        %c0_10 = arith.constant 0 : index
        %c0_11 = arith.constant 0 : index
        %22 = vector.load %arg12[%c0_10, %c0_11] : memref<128x256xf32, #tpu.memory_space<vmem>>, vector<128x256xf32>
        %23 = arith.addf %22, %12 : vector<128x256xf32>
        %c0_12 = arith.constant 0 : index
        %c0_13 = arith.constant 0 : index
        %24 = vector.load %arg12[%c0_12, %c0_13] : memref<128x256xf32, #tpu.memory_space<vmem>>, vector<128x256xf32>
        tpu.vector_store %arg12[%c0_12, %c0_13], %23 {strides = array<i32>} : memref<128x256xf32, #tpu.memory_space<vmem>>, vector<128x256xf32>,
      } else {
      }
      %c0_i32_8 = arith.constant 0 : i32
      %19 = arith.cmpi eq, %arg2, %c0_i32_8 : i32
      %20 = arith.extui %19 : i1 to i32
      %c0_i32_9 = arith.constant 0 : i32
      %21 = arith.cmpi ne, %20, %c0_i32_9 : i32
      scf.if %21 {
        %c0_10 = arith.constant 0 : index
        %c0_11 = arith.constant 0 : index
        %22 = vector.load %arg12[%c0_10, %c0_11] : memref<128x256xf32, #tpu.memory_space<vmem>>, vector<128x256xf32>
        %c0_12 = arith.constant 0 : index
        %c0_13 = arith.constant 0 : index
        %23 = vector.load %arg8[%c0_12, %c0_13] : memref<1x256xf32, #tpu.memory_space<vmem>>, vector<1x256xf32>
        %24 = vector.broadcast %23 : vector<1x256xf32> to vector<128x256xf32>
        %25 = arith.addf %22, %24 : vector<128x256xf32>
        %c0_14 = arith.constant 0 : index
        %c0_15 = arith.constant 0 : index
        %26 = vector.load %arg9[%c0_14, %c0_15] : memref<128x256xf32, #tpu.memory_space<vmem>>, vector<128x256xf32>
        tpu.vector_store %arg9[%c0_14, %c0_15], %25 {strides = array<i32>} : memref<128x256xf32, #tpu.memory_space<vmem>>, vector<128x256xf32>,
      } else {
      }
    } else {
    }
    return
  }
  func.func @transform_0(%arg0: i32, %arg1: i32, %arg2: i32) -> (i32, i32) {
    %0 = arith.subi %arg1, %arg2 : i32
    %1 = arith.muli %0, %arg0 : i32
    %2 = arith.addi %arg2, %1 : i32
    %3 = arith.subi %arg2, %arg1 : i32
    %4 = arith.muli %3, %arg0 : i32
    %5 = arith.addi %arg1, %4 : i32
    %c0_i32 = arith.constant 0 : i32
    return %2, %5 : i32, i32
  }
  func.func @transform_1(%arg0: i32, %arg1: i32, %arg2: i32) -> (i32, i32) {
    %c1_i32 = arith.constant 1 : i32
    %0 = arith.subi %c1_i32, %arg0 : i32
    %1 = arith.muli %arg1, %0 : i32
    %c0_i32 = arith.constant 0 : i32
    %2 = arith.muli %c0_i32, %arg0 : i32
    %3 = arith.addi %1, %2 : i32
    %c0_i32_0 = arith.constant 0 : i32
    %c0_i32_1 = arith.constant 0 : i32
    return %3, %c0_i32_0 : i32, i32
  }
  func.func @transform_2(%arg0: i32, %arg1: i32, %arg2: i32) -> (i32, i32) {
    %c0_i32 = arith.constant 0 : i32
    %c0_i32_0 = arith.constant 0 : i32
    %c0_i32_1 = arith.constant 0 : i32
    return %c0_i32, %c0_i32_0 : i32, i32
  }
  func.func @transform_3(%arg0: i32, %arg1: i32, %arg2: i32) -> (i32, i32) {
    %c0_i32 = arith.constant 0 : i32
    %c0_i32_0 = arith.constant 0 : i32
    %c0_i32_1 = arith.constant 0 : i32
    return %c0_i32, %c0_i32_0 : i32, i32
  }
  func.func @transform_4(%arg0: i32, %arg1: i32, %arg2: i32) -> (i32, i32) {
    %c0_i32 = arith.constant 0 : i32
    %c0_i32_0 = arith.constant 0 : i32
    %c0_i32_1 = arith.constant 0 : i32
    return %c0_i32, %c0_i32_0 : i32, i32
  }
  func.func @transform_5(%arg0: i32, %arg1: i32, %arg2: i32) -> (i32, i32) {
    %c0_i32 = arith.constant 0 : i32
    %c0_i32_0 = arith.constant 0 : i32
    %c0_i32_1 = arith.constant 0 : i32
    return %c0_i32, %c0_i32_0 : i32, i32
  }
  func.func @transform_6(%arg0: i32, %arg1: i32, %arg2: i32) -> (i32, i32) {
    %0 = arith.muli %arg1, %arg0 : i32
    %c0_i32 = arith.constant 0 : i32
    %c0_i32_0 = arith.constant 0 : i32
    return %0, %c0_i32 : i32, i32
  }
}

module attributes {stable_mosaic.version = 11 : i64} {
  func.func @_gcn2_kernel(%arg0: i32, %arg1: i32, %arg2: i32, %arg3: memref<128x128xbf16, #tpu.memory_space<vmem>>, %arg4: memref<128x128xf32, #tpu.memory_space<vmem>>, %arg5: memref<128x128xf32, #tpu.memory_space<vmem>>, %arg6: memref<1x128xf32, #tpu.memory_space<vmem>>, %arg7: memref<128x128xf32, #tpu.memory_space<vmem>>, %arg8: memref<1x128xf32, #tpu.memory_space<vmem>>, %arg9: memref<128x128xf32, #tpu.memory_space<vmem>>, %arg10: memref<128x128xf32, #tpu.memory_space<vmem>>, %arg11: memref<128x128xbf16, #tpu.memory_space<vmem>>, %arg12: memref<128x128xf32, #tpu.memory_space<vmem>>) attributes {dimension_semantics = [#tpu.dimension_semantics<arbitrary>, #tpu.dimension_semantics<arbitrary>, #tpu.dimension_semantics<arbitrary>], iteration_bounds = array<i64: 2, 1, 1>, scalar_prefetch = 0 : i64, scratch_operands = 3 : i64, tpu.core_type = #tpu.core_type<tc>, window_params = [{transform_indices = @transform_0, window_bounds = array<i64: 128, 128>}, {transform_indices = @transform_1, window_bounds = array<i64: 128, 128>}, {pipeline_mode = #tpu.pipeline_mode<synchronous>, transform_indices = @transform_2, window_bounds = array<i64: 128, 128>}, {pipeline_mode = #tpu.pipeline_mode<synchronous>, transform_indices = @transform_3, window_bounds = array<i64: 1, 128>}, {pipeline_mode = #tpu.pipeline_mode<synchronous>, transform_indices = @transform_4, window_bounds = array<i64: 128, 128>}, {pipeline_mode = #tpu.pipeline_mode<synchronous>, transform_indices = @transform_5, window_bounds = array<i64: 1, 128>}, {transform_indices = @transform_6, window_bounds = array<i64: 128, 128>}]} {
    %c0_i32 = arith.constant 0 : i32
    %0 = arith.cmpi eq, %arg0, %c0_i32 : i32
    %1 = arith.extui %0 : i1 to i32
    %c0_i32_0 = arith.constant 0 : i32
    %2 = arith.cmpi ne, %1, %c0_i32_0 : i32
    scf.if %2 {
      %c0_i32_2 = arith.constant 0 : i32
      %6 = arith.cmpi eq, %arg2, %c0_i32_2 : i32
      %7 = arith.extui %6 : i1 to i32
      %c0_i32_3 = arith.constant 0 : i32
      %8 = arith.cmpi ne, %7, %c0_i32_3 : i32
      scf.if %8 {
        %c0_13 = arith.constant 0 : index
        %c0_14 = arith.constant 0 : index
        %23 = vector.load %arg4[%c0_13, %c0_14] : memref<128x128xf32, #tpu.memory_space<vmem>>, vector<128x128xf32>
        %c0_15 = arith.constant 0 : index
        %c0_16 = arith.constant 0 : index
        %24 = vector.load %arg5[%c0_15, %c0_16] : memref<128x128xf32, #tpu.memory_space<vmem>>, vector<128x128xf32>
        %cst_17 = arith.constant dense<0.000000e+00> : vector<128x128xf32>
        %25 = tpu.matmul %23, %24, %cst_17 {dimension_numbers = #tpu.dot_dimension_numbers<[1], [0], [0], [1], [0, 0, 1, 1], [], []>} : vector<128x128xf32>, vector<128x128xf32>, vector<128x128xf32> -> vector<128x128xf32>
        %26 = arith.truncf %25 : vector<128x128xf32> to vector<128x128xbf16>
        %c0_18 = arith.constant 0 : index
        %c0_19 = arith.constant 0 : index
        %27 = vector.load %arg11[%c0_18, %c0_19] : memref<128x128xbf16, #tpu.memory_space<vmem>>, vector<128x128xbf16>
        tpu.vector_store %arg11[%c0_18, %c0_19], %26 {strides = array<i32>} : memref<128x128xbf16, #tpu.memory_space<vmem>>, vector<128x128xbf16>,
      } else {
      }
      %c0 = arith.constant 0 : index
      %c0_4 = arith.constant 0 : index
      %9 = vector.load %arg3[%c0, %c0_4] : memref<128x128xbf16, #tpu.memory_space<vmem>>, vector<128x128xbf16>
      %c0_5 = arith.constant 0 : index
      %c0_6 = arith.constant 0 : index
      %10 = vector.load %arg11[%c0_5, %c0_6] : memref<128x128xbf16, #tpu.memory_space<vmem>>, vector<128x128xbf16>
      %cst = arith.constant dense<0.000000e+00> : vector<128x128xf32>
      %11 = tpu.matmul %9, %10, %cst {dimension_numbers = #tpu.dot_dimension_numbers<[1], [0], [0], [1], [0, 0, 1, 1], [], []>} : vector<128x128xbf16>, vector<128x128xbf16>, vector<128x128xf32> -> vector<128x128xf32>
      %c128_i32 = arith.constant 128 : i32
      %12 = arith.muli %arg2, %c128_i32 : i32
      %13 = tpu.assume_multiple %12, 128 : i32
      %c0_i32_7 = arith.constant 0 : i32
      %14 = arith.cmpi eq, %arg1, %c0_i32_7 : i32
      %15 = arith.extui %14 : i1 to i32
      %c0_i32_8 = arith.constant 0 : i32
      %16 = arith.cmpi ne, %15, %c0_i32_8 : i32
      scf.if %16 {
        %23 = arith.index_cast %13 : i32 to index
        %c0_13 = arith.constant 0 : index
        %24 = vector.load %arg10[%23, %c0_13] : memref<128x128xf32, #tpu.memory_space<vmem>>, vector<128x128xf32>
        tpu.vector_store %arg10[%23, %c0_13], %11 {strides = array<i32>} : memref<128x128xf32, #tpu.memory_space<vmem>>, vector<128x128xf32>,
      } else {
      }
      %c0_i32_9 = arith.constant 0 : i32
      %17 = arith.cmpi sgt, %arg1, %c0_i32_9 : i32
      %18 = arith.extui %17 : i1 to i32
      %c0_i32_10 = arith.constant 0 : i32
      %19 = arith.cmpi ne, %18, %c0_i32_10 : i32
      scf.if %19 {
        %23 = arith.index_cast %13 : i32 to index
        %c0_13 = arith.constant 0 : index
        %24 = vector.load %arg10[%23, %c0_13] : memref<128x128xf32, #tpu.memory_space<vmem>>, vector<128x128xf32>
        %25 = arith.addf %24, %11 : vector<128x128xf32>
        %26 = arith.index_cast %13 : i32 to index
        %c0_14 = arith.constant 0 : index
        %27 = vector.load %arg10[%26, %c0_14] : memref<128x128xf32, #tpu.memory_space<vmem>>, vector<128x128xf32>
        tpu.vector_store %arg10[%26, %c0_14], %25 {strides = array<i32>} : memref<128x128xf32, #tpu.memory_space<vmem>>, vector<128x128xf32>,
      } else {
      }
      %c0_i32_11 = arith.constant 0 : i32
      %20 = arith.cmpi eq, %arg1, %c0_i32_11 : i32
      %21 = arith.extui %20 : i1 to i32
      %c0_i32_12 = arith.constant 0 : i32
      %22 = arith.cmpi ne, %21, %c0_i32_12 : i32
      scf.if %22 {
        %23 = arith.index_cast %13 : i32 to index
        %c0_13 = arith.constant 0 : index
        %24 = vector.load %arg10[%23, %c0_13] : memref<128x128xf32, #tpu.memory_space<vmem>>, vector<128x128xf32>
        %c0_14 = arith.constant 0 : index
        %c0_15 = arith.constant 0 : index
        %25 = vector.load %arg6[%c0_14, %c0_15] : memref<1x128xf32, #tpu.memory_space<vmem>>, vector<1x128xf32>
        %26 = vector.broadcast %25 : vector<1x128xf32> to vector<128x128xf32>
        %27 = arith.addf %24, %26 : vector<128x128xf32>
        %cst_16 = arith.constant 0.000000e+00 : f32
        %28 = vector.broadcast %cst_16 : f32 to vector<128x128xf32>
        %29 = arith.maximumf %27, %28 : vector<128x128xf32>
        %c0_17 = arith.constant 0 : index
        %c0_18 = arith.constant 0 : index
        %30 = vector.load %arg7[%c0_17, %c0_18] : memref<128x128xf32, #tpu.memory_space<vmem>>, vector<128x128xf32>
        %cst_19 = arith.constant dense<0.000000e+00> : vector<128x128xf32>
        %31 = tpu.matmul %29, %30, %cst_19 {dimension_numbers = #tpu.dot_dimension_numbers<[1], [0], [0], [1], [0, 0, 1, 1], [], []>} : vector<128x128xf32>, vector<128x128xf32>, vector<128x128xf32> -> vector<128x128xf32>
        %32 = arith.index_cast %13 : i32 to index
        %c0_20 = arith.constant 0 : index
        %33 = vector.load %arg10[%32, %c0_20] : memref<128x128xf32, #tpu.memory_space<vmem>>, vector<128x128xf32>
        tpu.vector_store %arg10[%32, %c0_20], %31 {strides = array<i32>} : memref<128x128xf32, #tpu.memory_space<vmem>>, vector<128x128xf32>,
      } else {
      }
    } else {
    }
    %c1_i32 = arith.constant 1 : i32
    %3 = arith.cmpi eq, %arg0, %c1_i32 : i32
    %4 = arith.extui %3 : i1 to i32
    %c0_i32_1 = arith.constant 0 : i32
    %5 = arith.cmpi ne, %4, %c0_i32_1 : i32
    scf.if %5 {
      %c128_i32 = arith.constant 128 : i32
      %6 = arith.muli %arg2, %c128_i32 : i32
      %7 = tpu.assume_multiple %6, 128 : i32
      %c0 = arith.constant 0 : index
      %c0_2 = arith.constant 0 : index
      %8 = vector.load %arg3[%c0, %c0_2] : memref<128x128xbf16, #tpu.memory_space<vmem>>, vector<128x128xbf16>
      %9 = arith.index_cast %7 : i32 to index
      %c0_3 = arith.constant 0 : index
      %10 = vector.load %arg10[%9, %c0_3] : memref<128x128xf32, #tpu.memory_space<vmem>>, vector<128x128xf32>
      %11 = arith.truncf %10 : vector<128x128xf32> to vector<128x128xbf16>
      %cst = arith.constant dense<0.000000e+00> : vector<128x128xf32>
      %12 = tpu.matmul %8, %11, %cst {dimension_numbers = #tpu.dot_dimension_numbers<[1], [0], [0], [1], [0, 0, 1, 1], [], []>} : vector<128x128xbf16>, vector<128x128xbf16>, vector<128x128xf32> -> vector<128x128xf32>
      %c0_i32_4 = arith.constant 0 : i32
      %13 = arith.cmpi eq, %arg2, %c0_i32_4 : i32
      %14 = arith.extui %13 : i1 to i32
      %c0_i32_5 = arith.constant 0 : i32
      %15 = arith.cmpi ne, %14, %c0_i32_5 : i32
      scf.if %15 {
        %c0_10 = arith.constant 0 : index
        %c0_11 = arith.constant 0 : index
        %22 = vector.load %arg12[%c0_10, %c0_11] : memref<128x128xf32, #tpu.memory_space<vmem>>, vector<128x128xf32>
        tpu.vector_store %arg12[%c0_10, %c0_11], %12 {strides = array<i32>} : memref<128x128xf32, #tpu.memory_space<vmem>>, vector<128x128xf32>,
      } else {
      }
      %c0_i32_6 = arith.constant 0 : i32
      %16 = arith.cmpi sgt, %arg2, %c0_i32_6 : i32
      %17 = arith.extui %16 : i1 to i32
      %c0_i32_7 = arith.constant 0 : i32
      %18 = arith.cmpi ne, %17, %c0_i32_7 : i32
      scf.if %18 {
        %c0_10 = arith.constant 0 : index
        %c0_11 = arith.constant 0 : index
        %22 = vector.load %arg12[%c0_10, %c0_11] : memref<128x128xf32, #tpu.memory_space<vmem>>, vector<128x128xf32>
        %23 = arith.addf %22, %12 : vector<128x128xf32>
        %c0_12 = arith.constant 0 : index
        %c0_13 = arith.constant 0 : index
        %24 = vector.load %arg12[%c0_12, %c0_13] : memref<128x128xf32, #tpu.memory_space<vmem>>, vector<128x128xf32>
        tpu.vector_store %arg12[%c0_12, %c0_13], %23 {strides = array<i32>} : memref<128x128xf32, #tpu.memory_space<vmem>>, vector<128x128xf32>,
      } else {
      }
      %c0_i32_8 = arith.constant 0 : i32
      %19 = arith.cmpi eq, %arg2, %c0_i32_8 : i32
      %20 = arith.extui %19 : i1 to i32
      %c0_i32_9 = arith.constant 0 : i32
      %21 = arith.cmpi ne, %20, %c0_i32_9 : i32
      scf.if %21 {
        %c0_10 = arith.constant 0 : index
        %c0_11 = arith.constant 0 : index
        %22 = vector.load %arg12[%c0_10, %c0_11] : memref<128x128xf32, #tpu.memory_space<vmem>>, vector<128x128xf32>
        %c0_12 = arith.constant 0 : index
        %c0_13 = arith.constant 0 : index
        %23 = vector.load %arg8[%c0_12, %c0_13] : memref<1x128xf32, #tpu.memory_space<vmem>>, vector<1x128xf32>
        %24 = vector.broadcast %23 : vector<1x128xf32> to vector<128x128xf32>
        %25 = arith.addf %22, %24 : vector<128x128xf32>
        %c0_14 = arith.constant 0 : index
        %c0_15 = arith.constant 0 : index
        %26 = vector.load %arg9[%c0_14, %c0_15] : memref<128x128xf32, #tpu.memory_space<vmem>>, vector<128x128xf32>
        tpu.vector_store %arg9[%c0_14, %c0_15], %25 {strides = array<i32>} : memref<128x128xf32, #tpu.memory_space<vmem>>, vector<128x128xf32>,
      } else {
      }
    } else {
    }
    return
  }
  func.func @transform_0(%arg0: i32, %arg1: i32, %arg2: i32) -> (i32, i32) {
    %0 = arith.subi %arg1, %arg2 : i32
    %1 = arith.muli %0, %arg0 : i32
    %2 = arith.addi %arg2, %1 : i32
    %3 = arith.subi %arg2, %arg1 : i32
    %4 = arith.muli %3, %arg0 : i32
    %5 = arith.addi %arg1, %4 : i32
    %c0_i32 = arith.constant 0 : i32
    return %2, %5 : i32, i32
  }
  func.func @transform_1(%arg0: i32, %arg1: i32, %arg2: i32) -> (i32, i32) {
    %c1_i32 = arith.constant 1 : i32
    %0 = arith.subi %c1_i32, %arg0 : i32
    %1 = arith.muli %arg1, %0 : i32
    %c0_i32 = arith.constant 0 : i32
    %2 = arith.muli %c0_i32, %arg0 : i32
    %3 = arith.addi %1, %2 : i32
    %c0_i32_0 = arith.constant 0 : i32
    %c0_i32_1 = arith.constant 0 : i32
    return %3, %c0_i32_0 : i32, i32
  }
  func.func @transform_2(%arg0: i32, %arg1: i32, %arg2: i32) -> (i32, i32) {
    %c0_i32 = arith.constant 0 : i32
    %c0_i32_0 = arith.constant 0 : i32
    %c0_i32_1 = arith.constant 0 : i32
    return %c0_i32, %c0_i32_0 : i32, i32
  }
  func.func @transform_3(%arg0: i32, %arg1: i32, %arg2: i32) -> (i32, i32) {
    %c0_i32 = arith.constant 0 : i32
    %c0_i32_0 = arith.constant 0 : i32
    %c0_i32_1 = arith.constant 0 : i32
    return %c0_i32, %c0_i32_0 : i32, i32
  }
  func.func @transform_4(%arg0: i32, %arg1: i32, %arg2: i32) -> (i32, i32) {
    %c0_i32 = arith.constant 0 : i32
    %c0_i32_0 = arith.constant 0 : i32
    %c0_i32_1 = arith.constant 0 : i32
    return %c0_i32, %c0_i32_0 : i32, i32
  }
  func.func @transform_5(%arg0: i32, %arg1: i32, %arg2: i32) -> (i32, i32) {
    %c0_i32 = arith.constant 0 : i32
    %c0_i32_0 = arith.constant 0 : i32
    %c0_i32_1 = arith.constant 0 : i32
    return %c0_i32, %c0_i32_0 : i32, i32
  }
  func.func @transform_6(%arg0: i32, %arg1: i32, %arg2: i32) -> (i32, i32) {
    %0 = arith.muli %arg1, %arg0 : i32
    %c0_i32 = arith.constant 0 : i32
    %c0_i32_0 = arith.constant 0 : i32
    return %0, %c0_i32 : i32, i32
  }
}

</mosaic_0001>

<bundles_post_ra>
// kernel: encoder_forward.3
= control target key start
LH: loop header
LB: loop body
LE: loop exit
PB: predicated region body
PF: predicated region fallthrough
CT: control target
= control target key end

     0   :  { %s1963_s21 = smov 0   ;;  %s1965_s22 = smov 0   ;;  %s2246_s0 = inlined_call_operand.vmem [shape: bf16[128,128], index: 0, kind: input, shape index: {}]   ;;  %s2247_s1 = inlined_call_operand.vmem [shape: f32[128,128], index: 1, kind: input, shape index: {}]   ;;  %s2248_s2 = inlined_call_operand.vmem [shape: f32[128,128], index: 2, kind: input, shape index: {}]   ;;  %s2249_s3 = inlined_call_operand.vmem [shape: f32[1,128], index: 3, kind: input, shape index: {}]   ;;  %s2250_s4 = inlined_call_operand.vmem [shape: f32[128,128], index: 4, kind: input, shape index: {}]   ;;  %s2251_s5 = inlined_call_operand.vmem [shape: f32[1,128], index: 5, kind: input, shape index: {}]   ;;  %s2252_s6 = inlined_call_operand.vmem [shape: f32[128,128], index: 6, kind: output, shape index: {}]  }
   0x1   :  { %s1967_s23 = smov 0  }
   0x2 LB: > { %s35_s24 = sadd.s32 1, %s1922_s22  ;;  %p1471_p0 = scmp.ge.s32.totalorder %s1926_s23, 1  ;;  %s1926_s23 = sphi %s1967_s23, %s16_s23   ;;  %s1922_s22 = sphi %s1965_s22, %s2254_s22   ;;  %s1918_s21 = sphi %s1963_s21, %s2253_s21  }
   0x3   : > { %p37_p1 = scmp.ge.s32.totalorder %s35_s24, 2  ;;  %p282_p2 = scmp.lt.s32.totalorder %s1926_s23, 3 }
   0x5   : > { %s2256_s24 = smov (%p37_p1, %s35_s24), 0  ;;  %p283_p3 = pnand %p1471_p0, %p282_p2 }
   0x6   : > { %p1472_p4 = scmp.ne.s32.totalorder (!%p283_p3), %s1918_s21, 0 }
   0x7   : > { %286 = sbr.rel (%p283_p3) target bundleno = 1019 (0x3fb), region = 44 }
   0xe   : > { %372 = sbr.rel (%p1472_p4) target bundleno = 757 (0x2f5), region = 48  ;;  %v393_v0 = vld [vmem:[%s2248_s2] sm:$0xff] (!%p1472_p4)  ;;  %v394_v1 = vld [vmem:[%s2248_s2 + $0x8] sm:$0xff] (!%p1472_p4)  ;;  %v395_v2 = vld [vmem:[%s2248_s2 + $0x10] sm:$0xff] (!%p1472_p4) }
   0xf   : > { %v1768_v3 = vpack.c.bf16 (!%p1472_p4), %v394_v1, %v393_v0  ;;  %v396_v4 = vld [vmem:[%s2248_s2 + $0x18] sm:$0xff] (!%p1472_p4)  ;;  %v397_v6 = vld [vmem:[%s2248_s2 + $0x20] sm:$0xff] (!%p1472_p4)  ;;  %v398_v7 = vld [vmem:[%s2248_s2 + $0x28] sm:$0xff] (!%p1472_p4) }
  0x10   : > { %v1772_v5 = vpack.c.bf16 (!%p1472_p4), %v396_v4, %v395_v2  ;;  %v1776_v8 = vpack.c.bf16 (!%p1472_p4), %v398_v7, %v397_v6  ;;  %v377_v9 = vld [vmem:[%s2247_s1] sm:$0xff] (!%p1472_p4)  ;;  %v399_v10 = vld [vmem:[%s2248_s2 + $0x30] sm:$0xff] (!%p1472_p4)  ;;  %v400_v11 = vld [vmem:[%s2248_s2 + $0x38] sm:$0xff] (!%p1472_p4) }
  0x11   : > { %1769 = vmatprep.subr.bf16.mxu0 (!%p1472_p4), %v1768_v3  ;;  %1624 = vmatprep.mubr.f32.mxu0 (!%p1472_p4), %v377_v9  ;;  %v1780_v12 = vpack.c.bf16 (!%p1472_p4), %v400_v11, %v399_v10  ;;  %v401_v13 = vld [vmem:[%s2248_s2 + $0x40] sm:$0xff] (!%p1472_p4)  ;;  %v402_v14 = vld [vmem:[%s2248_s2 + $0x48] sm:$0xff] (!%p1472_p4)  ;;  %v403_v15 = vld [vmem:[%s2248_s2 + $0x50] sm:$0xff] (!%p1472_p4) }
  0x12   : > { %1771 = vmatpush3.bf16.msra.mxu0 (!%p1472_p4), %v1768_v3  ;;  %v404_v16 = vld [vmem:[%s2248_s2 + $0x58] sm:$0xff] (!%p1472_p4)  ;;  %v1784_v17 = vpack.c.bf16 (!%p1472_p4), %v402_v14, %v401_v13  ;;  %v405_v19 = vld [vmem:[%s2248_s2 + $0x60] sm:$0xff] (!%p1472_p4)  ;;  %v406_v20 = vld [vmem:[%s2248_s2 + $0x68] sm:$0xff] (!%p1472_p4) }
  0x13   : > { %1773 = vmatprep.subr.bf16.mxu0 (!%p1472_p4), %v1772_v5  ;;  %v1788_v18 = vpack.c.bf16 (!%p1472_p4), %v404_v16, %v403_v15  ;;  %v1792_v21 = vpack.c.bf16 (!%p1472_p4), %v406_v20, %v405_v19  ;;  %v407_v22 = vld [vmem:[%s2248_s2 + $0x70] sm:$0xff] (!%p1472_p4)  ;;  %v408_v23 = vld [vmem:[%s2248_s2 + $0x78] sm:$0xff] (!%p1472_p4)  ;;  %v378_v25 = vld [vmem:[%s2247_s1 + $0x8] sm:$0xff] (!%p1472_p4) }
  0x14   : > { %v1796_v24 = vpack.c.bf16 (!%p1472_p4), %v408_v23, %v407_v22  ;;  %v379_v26 = vld [vmem:[%s2247_s1 + $0x10] sm:$0xff] (!%p1472_p4)  ;;  %v380_v27 = vld [vmem:[%s2247_s1 + $0x18] sm:$0xff] (!%p1472_p4)  ;;  %v381_v28 = vld [vmem:[%s2247_s1 + $0x20] sm:$0xff] (!%p1472_p4) }
  0x15   : > { %v382_v29 = vld [vmem:[%s2247_s1 + $0x28] sm:$0xff]  ;;  %v383_v30 = vld [vmem:[%s2247_s1 + $0x30] sm:$0xff]  ;;  %v384_v31 = vld [vmem:[%s2247_s1 + $0x38] sm:$0xff] }
  0x16   : > { %1775 = vmatpush3.bf16.msra.mxu0 %v1772_v5  ;;  %v385_v32 = vld [vmem:[%s2247_s1 + $0x40] sm:$0xff]  ;;  %v386_v33 = vld [vmem:[%s2247_s1 + $0x48] sm:$0xff]  ;;  %v387_v34 = vld [vmem:[%s2247_s1 + $0x50] sm:$0xff] }
  0x17   : > { %1777 = vmatprep.subr.bf16.mxu0 %v1776_v8  ;;  %v388_v35 = vld [vmem:[%s2247_s1 + $0x58] sm:$0xff]  ;;  %v389_v36 = vld [vmem:[%s2247_s1 + $0x60] sm:$0xff]  ;;  %v390_v37 = vld [vmem:[%s2247_s1 + $0x68] sm:$0xff] }
  0x18   : > { %v391_v38 = vld [vmem:[%s2247_s1 + $0x70] sm:$0xff]  ;;  %v392_v39 = vld [vmem:[%s2247_s1 + $0x78] sm:$0xff]  ;;  %v1888_v40 = vld [vmem:[%s2246_s0] sm:$0xff]  }
  0x19   : > { %1664 = vmatprep.mubr.bf16.mxu1 %v1888_v40  ;;  %v873_v41 = vld [vmem:[%s2250_s4] sm:$0xff]  ;;  %v874_v42 = vld [vmem:[%s2250_s4 + $0x8] sm:$0xff]  ;;  %v875_v43 = vld [vmem:[%s2250_s4 + $0x10] sm:$0xff] }
  0x1a   : > { %1779 = vmatpush3.bf16.msra.mxu0 %v1776_v8  ;;  %v1800_v44 = vpack.c.bf16 %v874_v42, %v873_v41  ;;  %v876_v45 = vld [vmem:[%s2250_s4 + $0x18] sm:$0xff]  ;;  %v877_v47 = vld [vmem:[%s2250_s4 + $0x20] sm:$0xff]  ;;  %v878_v48 = vld [vmem:[%s2250_s4 + $0x28] sm:$0xff] }
  0x1b   : > { %1781 = vmatprep.subr.bf16.mxu0 %v1780_v12  ;;  %v2095_v46 = vpack.c.bf16 %v876_v45, %v875_v43  ;;  %v1808_v49 = vpack.c.bf16 %v878_v48, %v877_v47  ;;  %v879_v50 = vld [vmem:[%s2250_s4 + $0x30] sm:$0xff]  ;;  %v880_v51 = vld [vmem:[%s2250_s4 + $0x38] sm:$0xff]  ;;  %v1889_v13 = vld [vmem:[%s2246_s0 + $0x8] sm:$0xff]  }
  0x1c   : > { %v1812_v52 = vpack.c.bf16 %v880_v51, %v879_v50  ;;  %v1890_v14 = vld [vmem:[%s2246_s0 + $0x10] sm:$0xff]   ;;  %v1891_v15 = vld [vmem:[%s2246_s0 + $0x18] sm:$0xff]   ;;  %v1892_v16 = vld [vmem:[%s2246_s0 + $0x20] sm:$0xff]  }
  0x1d   : > { %v1895_v19 = vld [vmem:[%s2246_s0 + $0x38] sm:$0xff]   ;;  %v881_v20 = vld [vmem:[%s2250_s4 + $0x40] sm:$0xff]  ;;  %v883_v23 = vld [vmem:[%s2250_s4 + $0x50] sm:$0xff] }
  0x1e   : > { %1783 = vmatpush3.bf16.msra.mxu0 %v1780_v12 }
  0x1f   : > { %1785 = vmatprep.subr.bf16.mxu0 %v1784_v17 }
  0x22   : > { %1787 = vmatpush3.bf16.msra.mxu0 %v1784_v17  ;;  %v1893_v17 = vld [vmem:[%s2246_s0 + $0x28] sm:$0xff]  }
  0x23   : > { %1789 = vmatprep.subr.bf16.mxu0 %v1788_v18 }
  0x26   : > { %1791 = vmatpush3.bf16.msra.mxu0 %v1788_v18  ;;  %v1894_v18 = vld [vmem:[%s2246_s0 + $0x30] sm:$0xff]  }
  0x27   : > { %1793 = vmatprep.subr.bf16.mxu0 %v1792_v21 }
  0x2a   : > { %1795 = vmatpush3.bf16.msra.mxu0 %v1792_v21  ;;  %v882_v21 = vld [vmem:[%s2250_s4 + $0x48] sm:$0xff] }
  0x2b   : > { %1797 = vmatprep.subr.bf16.mxu0 %v1796_v24  ;;  %v1816_v22 = vpack.c.bf16 %v882_v21, %v881_v20 }
  0x2e   : > { %1799 = vmatpush3.bf16.msra.mxu0 %v1796_v24  ;;  %v884_v24 = vld [vmem:[%s2250_s4 + $0x58] sm:$0xff] }
  0x2f   : > { %1801 = vmatprep.subr.bf16.mxu0 %v1800_v44 }
  0x31   : > { %1625 = vmatmul.mubr.f32.vlgmr.msra.gmra.mrb[0].mxu0 %v378_v25  ;;  %v1820_v25 = vpack.c.bf16 %v884_v24, %v883_v23 }
  0x32   : > { %1627 = vmatprep.mubr.f32.mxu0 %v379_v26  ;;  %1803 = vmatpush3.bf16.msra.mxu0 %v1800_v44  ;;  %v885_v26 = vld [vmem:[%s2250_s4 + $0x60] sm:$0xff] }
  0x33   : > { %1805 = vmatprep.subr.bf16.mxu0 %v2095_v46 }
  0x35   : > { %1628 = vmatmul.mubr.f32.gmra.mrb[2].mxu0 %v380_v27  ;;  %v886_v27 = vld [vmem:[%s2250_s4 + $0x68] sm:$0xff] }
  0x36   : > { %1630 = vmatprep.mubr.f32.mxu0 %v381_v28  ;;  %1807 = vmatpush3.bf16.msra.mxu0 %v2095_v46  ;;  %v1824_v28 = vpack.c.bf16 %v886_v27, %v885_v26 }
  0x37   : > { %1809 = vmatprep.subr.bf16.mxu0 %v1808_v49 }
  0x39   : > { %1631 = vmatmul.mubr.f32.gmra.mrb[4].mxu0 %v382_v29  ;;  %v887_v29 = vld [vmem:[%s2250_s4 + $0x70] sm:$0xff] }
  0x3a   : > { %1633 = vmatprep.mubr.f32.mxu0 %v383_v30  ;;  %1811 = vmatpush3.bf16.msra.mxu0 %v1808_v49  ;;  %v888_v30 = vld [vmem:[%s2250_s4 + $0x78] sm:$0xff] }
  0x3b   : > { %1813 = vmatprep.subr.bf16.mxu0 %v1812_v52 }
  0x3d   : > { %1634 = vmatmul.mubr.f32.gmra.mrb[6].mxu0 %v384_v31  ;;  %v1828_v31 = vpack.c.bf16 %v888_v30, %v887_v29 }
  0x3e   : > { %1636 = vmatprep.mubr.f32.mxu0 %v385_v32  ;;  %1815 = vmatpush3.bf16.msra.mxu0 %v1812_v52  ;;  %v1481_v32 = vld [vmem:[%s2249_s3] ss:$0 sm:$0xff] }
  0x3f   : > { %1817 = vmatprep.subr.bf16.mxu0 %v1816_v22 }
  0x41   : > { %1637 = vmatmul.mubr.f32.gmra.mrb[8].mxu0 %v386_v33 }
  0x42   : > { %1639 = vmatprep.mubr.f32.mxu0 %v387_v34  ;;  %1819 = vmatpush3.bf16.msra.mxu0 %v1816_v22 }
  0x43   : > { %1821 = vmatprep.subr.bf16.mxu0 %v1820_v25 }
  0x45   : > { %1640 = vmatmul.mubr.f32.gmra.mrb[10].mxu0 %v388_v35 }
  0x46   : > { %1642 = vmatprep.mubr.f32.mxu0 %v389_v36  ;;  %1823 = vmatpush3.bf16.msra.mxu0 %v1820_v25 }
  0x47   : > { %1825 = vmatprep.subr.bf16.mxu0 %v1824_v28 }
  0x49   : > { %1643 = vmatmul.mubr.f32.gmra.mrb[12].mxu0 %v390_v37 }
  0x4a   : > { %1645 = vmatprep.mubr.f32.mxu0 %v391_v38  ;;  %1827 = vmatpush3.bf16.msra.mxu0 %v1824_v28 }
  0x4b   : > { %1829 = vmatprep.subr.bf16.mxu0 %v1828_v31 }
  0x4d   : > { %1646 = vmatmul.mubr.f32.gmra.mrb[14].mxu0 %v392_v39 }
  0x4e   : > { %1831 = vmatpush3.bf16.msra.mxu0 %v1828_v31 }
 0x104   : > { %v1626_v53 = vpop.f32.mrb[0].mxu0 }
 0x105   : > { %v475_v54 = vpop.f32.mrb[1].mxu0 }
 0x106   : > { %v554_v55 = vpack.c.bf16 %v1626_v53, %v475_v54 }
 0x108   : > { %v1629_v56 = vpop.f32.mrb[2].mxu0  ;;  %1648 = vmatprep.subr.bf16.mxu1 %v554_v55 }
 0x109   : > { %v485_v57 = vpop.f32.mrb[3].mxu0  ;;  %1649 = vmatpush3.bf16.msra.mxu1 %v554_v55 }
 0x10a   : > { %v555_v58 = vpack.c.bf16 %v1629_v56, %v485_v57 }
 0x10c   : > { %v1632_v59 = vpop.f32.mrb[4].mxu0  ;;  %1650 = vmatprep.subr.bf16.mxu1 %v555_v58 }
 0x10d   : > { %v495_v60 = vpop.f32.mrb[5].mxu0  ;;  %1651 = vmatpush3.bf16.msra.mxu1 %v555_v58 }
 0x10e   : > { %v556_v61 = vpack.c.bf16 %v1632_v59, %v495_v60 }
 0x110   : > { %v1635_v62 = vpop.f32.mrb[6].mxu0  ;;  %1652 = vmatprep.subr.bf16.mxu1 %v556_v61 }
 0x111   : > { %v505_v63 = vpop.f32.mrb[7].mxu0  ;;  %1653 = vmatpush3.bf16.msra.mxu1 %v556_v61 }
 0x112   : > { %v557_v0 = vpack.c.bf16 %v1635_v62, %v505_v63 }
 0x114   : > { %v1638_v1 = vpop.f32.mrb[8].mxu0  ;;  %1654 = vmatprep.subr.bf16.mxu1 %v557_v0 }
 0x115   : > { %v515_v2 = vpop.f32.mrb[9].mxu0  ;;  %1655 = vmatpush3.bf16.msra.mxu1 %v557_v0 }
 0x116   : > { %v558_v3 = vpack.c.bf16 %v1638_v1, %v515_v2 }
 0x118   : > { %v1641_v4 = vpop.f32.mrb[10].mxu0  ;;  %1656 = vmatprep.subr.bf16.mxu1 %v558_v3 }
 0x119   : > { %v525_v5 = vpop.f32.mrb[11].mxu0  ;;  %1657 = vmatpush3.bf16.msra.mxu1 %v558_v3 }
 0x11a   : > { %v559_v6 = vpack.c.bf16 %v1641_v4, %v525_v5 }
 0x11c   : > { %v1644_v7 = vpop.f32.mrb[12].mxu0  ;;  %1658 = vmatprep.subr.bf16.mxu1 %v559_v6 }
 0x11d   : > { %v535_v8 = vpop.f32.mrb[13].mxu0  ;;  %1659 = vmatpush3.bf16.msra.mxu1 %v559_v6 }
 0x11e   : > { %v560_v9 = vpack.c.bf16 %v1644_v7, %v535_v8 }
 0x120   : > { %v1647_v10 = vpop.f32.mrb[14].mxu0  ;;  %1660 = vmatprep.subr.bf16.mxu1 %v560_v9 }
 0x121   : > { %v545_v11 = vpop.f32.mrb[15].mxu0  ;;  %1661 = vmatpush3.bf16.msra.mxu1 %v560_v9 }
 0x122   : > { %v561_v12 = vpack.c.bf16 %v1647_v10, %v545_v11 }
 0x124   : > { %1662 = vmatprep.subr.bf16.mxu1 %v561_v12 }
 0x125   : > { %1663 = vmatpush3.bf16.msra.mxu1 %v561_v12 }
 0x126   : > { %1832 = vmatprep.subr.bf16.mxu1 %v1800_v44 }
 0x128   : > { %1665 = vmatmul.mubr.bf16.vlgmr.msra.gmra.mrb[0].mxu1 %v1889_v13 }
 0x129   : > { %1668 = vmatprep.mubr.bf16.mxu1 %v1890_v14  ;;  %1840 = vmatpush3.bf16.msra.mxu1 %v1800_v44 }
 0x12a   : > { %1833 = vmatprep.subr.bf16.mxu1 %v2095_v46 }
 0x12d   : > { %1841 = vmatpush3.bf16.msra.mxu1 %v2095_v46 }
 0x12e   : > { %1834 = vmatprep.subr.bf16.mxu1 %v1808_v49 }
 0x130   : > { %1669 = vmatmul.mubr.bf16.gmra.mrb[4].mxu1 %v1891_v15 }
 0x131   : > { %1672 = vmatprep.mubr.bf16.mxu1 %v1892_v16  ;;  %1842 = vmatpush3.bf16.msra.mxu1 %v1808_v49 }
 0x132   : > { %1835 = vmatprep.subr.bf16.mxu1 %v1812_v52 }
 0x135   : > { %1843 = vmatpush3.bf16.msra.mxu1 %v1812_v52 }
 0x136   : > { %1836 = vmatprep.subr.bf16.mxu1 %v1816_v22 }
 0x138   : > { %1673 = vmatmul.mubr.bf16.gmra.mrb[8].mxu1 %v1893_v17 }
 0x139   : > { %1676 = vmatprep.mubr.bf16.mxu1 %v1894_v18  ;;  %1844 = vmatpush3.bf16.msra.mxu1 %v1816_v22 }
 0x13a   : > { %1837 = vmatprep.subr.bf16.mxu1 %v1820_v25 }
 0x13d   : > { %1845 = vmatpush3.bf16.msra.mxu1 %v1820_v25 }
 0x13e   : > { %1838 = vmatprep.subr.bf16.mxu1 %v1824_v28 }
 0x140   : > { %1677 = vmatmul.mubr.bf16.gmra.mrb[12].mxu1 %v1895_v19 }
 0x141   : > { %1846 = vmatpush3.bf16.msra.mxu1 %v1824_v28 }
 0x142   : > { %1839 = vmatprep.subr.bf16.mxu1 %v1828_v31 }
 0x145   : > { %1847 = vmatpush3.bf16.msra.mxu1 %v1828_v31 }
 0x1fb   : > { %v1666_v33 = vpop.f32.mrb[0].mxu1 }
 0x1fc   : > { %v676_v34 = vpop.f32.mrb[1].mxu1  ;;  %v843_v38 = vadd.f32 %v1666_v33, %v1481_v32 }
 0x1fd   : > { %v1667_v35 = vpop.f32.mrb[2].mxu1  ;;  %v841_v36 = vadd.f32 %v1481_v32, %v676_v34 }
 0x1fe   : > { %v679_v37 = vpop.f32.mrb[3].mxu1  ;;  %v844_v42 = vadd.f32 %v1667_v35, %v1481_v32  ;;  %v859_v43 = vmax.f32 %v843_v38, 0.0 }
 0x1ff   : > { %v857_v39 = vmax.f32 %v841_v36, 0.0  ;;  %v842_v40 = vadd.f32 %v1481_v32, %v679_v37 }
 0x200   : > { %v860_v47 = vmax.f32 %v844_v42, 0.0 }
 0x201   : > { %1712 = vmatprep.mubr.f32.mxu0 %v857_v39  ;;  %v858_v41 = vmax.f32 %v842_v40, 0.0 }
 0x203   : > { %v1670_v44 = vpop.f32.mrb[4].mxu1  ;;  %1713 = vmatmul.mubr.f32.vlgmr.msra.gmra.mrb[16].mxu0 %v858_v41 }
 0x204   : > { %v692_v45 = vpop.f32.mrb[5].mxu1  ;;  %1715 = vmatprep.mubr.f32.mxu0 %v859_v43  ;;  %v847_v50 = vadd.f32 %v1670_v44, %v1481_v32 }
 0x205   : > { %v1671_v46 = vpop.f32.mrb[6].mxu1  ;;  %v845_v48 = vadd.f32 %v1481_v32, %v692_v45 }
 0x206   : > { %v695_v49 = vpop.f32.mrb[7].mxu1  ;;  %v848_v54 = vadd.f32 %v1671_v46, %v1481_v32  ;;  %v863_v55 = vmax.f32 %v847_v50, 0.0 }
 0x207   : > { %1716 = vmatmul.mubr.f32.gmra.mrb[18].mxu0 %v860_v47  ;;  %v861_v51 = vmax.f32 %v845_v48, 0.0  ;;  %v846_v52 = vadd.f32 %v1481_v32, %v695_v49 }
 0x208   : > { %v864_v59 = vmax.f32 %v848_v54, 0.0 }
 0x209   : > { %1718 = vmatprep.mubr.f32.mxu0 %v861_v51  ;;  %v862_v53 = vmax.f32 %v846_v52, 0.0 }
 0x20b   : > { %v1674_v56 = vpop.f32.mrb[8].mxu1  ;;  %1719 = vmatmul.mubr.f32.gmra.mrb[20].mxu0 %v862_v53 }
 0x20c   : > { %v708_v57 = vpop.f32.mrb[9].mxu1  ;;  %1721 = vmatprep.mubr.f32.mxu0 %v863_v55  ;;  %v851_v62 = vadd.f32 %v1674_v56, %v1481_v32 }
 0x20d   : > { %v1675_v58 = vpop.f32.mrb[10].mxu1  ;;  %v849_v60 = vadd.f32 %v1481_v32, %v708_v57 }
 0x20e   : > { %v711_v61 = vpop.f32.mrb[11].mxu1  ;;  %v852_v2 = vadd.f32 %v1675_v58, %v1481_v32  ;;  %v867_v3 = vmax.f32 %v851_v62, 0.0 }
 0x20f   : > { %1722 = vmatmul.mubr.f32.gmra.mrb[22].mxu0 %v864_v59  ;;  %v865_v63 = vmax.f32 %v849_v60, 0.0  ;;  %v850_v0 = vadd.f32 %v1481_v32, %v711_v61 }
 0x210   : > { %v868_v7 = vmax.f32 %v852_v2, 0.0 }
 0x211   : > { %1724 = vmatprep.mubr.f32.mxu1 %v865_v63  ;;  %v866_v1 = vmax.f32 %v850_v0, 0.0 }
 0x213   : > { %v1678_v4 = vpop.f32.mrb[12].mxu1  ;;  %1725 = vmatmul.mubr.f32.vlgmr.msra.gmra.mrb[16].mxu1 %v866_v1 }
 0x214   : > { %v724_v5 = vpop.f32.mrb[13].mxu1  ;;  %1727 = vmatprep.mubr.f32.mxu1 %v867_v3  ;;  %v855_v10 = vadd.f32 %v1678_v4, %v1481_v32 }
 0x215   : > { %v1679_v6 = vpop.f32.mrb[14].mxu1  ;;  %v853_v8 = vadd.f32 %v1481_v32, %v724_v5 }
 0x216   : > { %v727_v9 = vpop.f32.mrb[15].mxu1  ;;  %v856_v14 = vadd.f32 %v1679_v6, %v1481_v32  ;;  %v871_v15 = vmax.f32 %v855_v10, 0.0 }
 0x217   : > { %1728 = vmatmul.mubr.f32.gmra.mrb[18].mxu1 %v868_v7  ;;  %v869_v11 = vmax.f32 %v853_v8, 0.0  ;;  %v854_v12 = vadd.f32 %v1481_v32, %v727_v9 }
 0x218   : > { %v872_v16 = vmax.f32 %v856_v14, 0.0 }
 0x219   : > { %1730 = vmatprep.mubr.f32.mxu1 %v869_v11  ;;  %v870_v13 = vmax.f32 %v854_v12, 0.0 }
 0x21b   : > { %1731 = vmatmul.mubr.f32.gmra.mrb[20].mxu1 %v870_v13 }
 0x21c   : > { %1733 = vmatprep.mubr.f32.mxu1 %v871_v15 }
 0x21f   : > { %1734 = vmatmul.mubr.f32.gmra.mrb[22].mxu1 %v872_v16 }
 0x2d6   : > { %v1714_v17 = vpop.f32.mrb[16].mxu0 }
 0x2d7   : > { %1035 = vst [vmem:[#allocation2 + $0x8] sm:$0xff] %v1714_v17  ;;  %v955_v18 = vpop.f32.mrb[17].mxu0 }
 0x2d8   : > { %1034 = vst [vmem:[#allocation2] sm:$0xff] %v955_v18 }
 0x2da   : > { %v1717_v19 = vpop.f32.mrb[18].mxu0 }
 0x2db   : > { %1037 = vst [vmem:[#allocation2 + $0x18] sm:$0xff] %v1717_v19  ;;  %v965_v20 = vpop.f32.mrb[19].mxu0 }
 0x2dc   : > { %1036 = vst [vmem:[#allocation2 + $0x10] sm:$0xff] %v965_v20 }
 0x2de   : > { %v1720_v21 = vpop.f32.mrb[20].mxu0 }
 0x2df   : > { %1039 = vst [vmem:[#allocation2 + $0x28] sm:$0xff] %v1720_v21  ;;  %v975_v22 = vpop.f32.mrb[21].mxu0 }
 0x2e0   : > { %1038 = vst [vmem:[#allocation2 + $0x20] sm:$0xff] %v975_v22 }
 0x2e2   : > { %v1723_v23 = vpop.f32.mrb[22].mxu0 }
 0x2e3   : > { %1041 = vst [vmem:[#allocation2 + $0x38] sm:$0xff] %v1723_v23  ;;  %v985_v24 = vpop.f32.mrb[23].mxu0 }
 0x2e4   : > { %1040 = vst [vmem:[#allocation2 + $0x30] sm:$0xff] %v985_v24 }
 0x2e6   : > { %v1726_v25 = vpop.f32.mrb[16].mxu1 }
 0x2e7   : > { %1043 = vst [vmem:[#allocation2 + $0x48] sm:$0xff] %v1726_v25  ;;  %v995_v26 = vpop.f32.mrb[17].mxu1 }
 0x2e8   : > { %1042 = vst [vmem:[#allocation2 + $0x40] sm:$0xff] %v995_v26 }
 0x2ea   : > { %v1729_v27 = vpop.f32.mrb[18].mxu1 }
 0x2eb   : > { %1045 = vst [vmem:[#allocation2 + $0x58] sm:$0xff] %v1729_v27  ;;  %v1005_v28 = vpop.f32.mrb[19].mxu1 }
 0x2ec   : > { %1044 = vst [vmem:[#allocation2 + $0x50] sm:$0xff] %v1005_v28 }
 0x2ee   : > { %v1732_v29 = vpop.f32.mrb[20].mxu1 }
 0x2ef   : > { %1047 = vst [vmem:[#allocation2 + $0x68] sm:$0xff] %v1732_v29  ;;  %v1015_v30 = vpop.f32.mrb[21].mxu1 }
 0x2f0   : > { %1046 = vst [vmem:[#allocation2 + $0x60] sm:$0xff] %v1015_v30 }
 0x2f2   : > { %v1735_v31 = vpop.f32.mrb[22].mxu1 }
 0x2f3   : > { %1049 = vst [vmem:[#allocation2 + $0x78] sm:$0xff] %v1735_v31  ;;  %v1025_v32 = vpop.f32.mrb[23].mxu1 }
 0x2f4   : > { %1048 = vst [vmem:[#allocation2 + $0x70] sm:$0xff] %v1025_v32 }
 0x2f5 PF: > { %p1482_p5 = scmp.ne.s32.totalorder %s1918_s21, 1 }
 0x2f6   : > { %v1072_v33 = vld [vmem:[#allocation2] sm:$0xff] (!%p1482_p5)  ;;  %v1073_v34 = vld [vmem:[#allocation2 + $0x8] sm:$0xff] (!%p1482_p5)  ;;  %v1074_v35 = vld [vmem:[#allocation2 + $0x10] sm:$0xff] (!%p1482_p5) }
 0x2f7   : > { %1053 = sbr.rel (%p1482_p5) target bundleno = 1019 (0x3fb), region = 68  ;;  %v1088_v36 = vpack.c.bf16 (!%p1482_p5), %v1073_v34, %v1072_v33  ;;  %v1075_v37 = vld [vmem:[#allocation2 + $0x18] sm:$0xff] (!%p1482_p5)  ;;  %v1076_v39 = vld [vmem:[#allocation2 + $0x20] sm:$0xff] (!%p1482_p5)  ;;  %v1077_v40 = vld [vmem:[#allocation2 + $0x28] sm:$0xff] (!%p1482_p5) }
 0x2f8   : > { %v1089_v38 = vpack.c.bf16 (!%p1482_p5), %v1075_v37, %v1074_v35  ;;  %v1078_v41 = vld [vmem:[#allocation2 + $0x30] sm:$0xff] (!%p1482_p5)  ;;  %v1090_v42 = vpack.c.bf16 (!%p1482_p5), %v1077_v40, %v1076_v39  ;;  %v1079_v43 = vld [vmem:[#allocation2 + $0x38] sm:$0xff] (!%p1482_p5)  ;;  %v1896_v44 = vld [vmem:[%s2246_s0] sm:$0xff] (!%p1482_p5)  }
 0x2f9   : > { %1736 = vmatprep.subr.bf16.mxu0 (!%p1482_p5), %v1088_v36  ;;  %1848 = vmatprep.subr.bf16.mxu1 (!%p1482_p5), %v1088_v36  ;;  %v1897_v45 = vld [vmem:[%s2246_s0 + $0x20] sm:$0xff] (!%p1482_p5)   ;;  %v1091_v46 = vpack.c.bf16 (!%p1482_p5), %v1079_v43, %v1078_v41  ;;  %v1081_v48 = vld [vmem:[#allocation2 + $0x48] sm:$0xff] (!%p1482_p5)  ;;  %v1082_v50 = vld [vmem:[#allocation2 + $0x50] sm:$0xff] (!%p1482_p5) }
 0x2fa   : > { %1737 = vmatpush3.bf16.msra.mxu0 (!%p1482_p5), %v1088_v36  ;;  %1856 = vmatpush3.bf16.msra.mxu1 (!%p1482_p5), %v1088_v36  ;;  %v1080_v47 = vld [vmem:[#allocation2 + $0x40] sm:$0xff] (!%p1482_p5)  ;;  %v1083_v51 = vld [vmem:[#allocation2 + $0x58] sm:$0xff] (!%p1482_p5)  ;;  %v1085_v54 = vld [vmem:[#allocation2 + $0x68] sm:$0xff] (!%p1482_p5) }
 0x2fb   : > { %1738 = vmatprep.subr.bf16.mxu0 (!%p1482_p5), %v1089_v38  ;;  %1849 = vmatprep.subr.bf16.mxu1 (!%p1482_p5), %v1089_v38  ;;  %v1092_v49 = vpack.c.bf16 (!%p1482_p5), %v1081_v48, %v1080_v47  ;;  %v1093_v52 = vpack.c.bf16 (!%p1482_p5), %v1083_v51, %v1082_v50  ;;  %v1084_v53 = vld [vmem:[#allocation2 + $0x60] sm:$0xff] (!%p1482_p5)  ;;  %v1086_v56 = vld [vmem:[#allocation2 + $0x70] sm:$0xff] (!%p1482_p5)  ;;  %v1087_v57 = vld [vmem:[#allocation2 + $0x78] sm:$0xff] (!%p1482_p5) }
 0x2fc   : > { %1752 = vmatprep.mubr.bf16.mxu0 (!%p1482_p5), %v1896_v44  ;;  %1760 = vmatprep.mubr.bf16.mxu1 (!%p1482_p5), %v1897_v45  ;;  %v1094_v55 = vpack.c.bf16 (!%p1482_p5), %v1085_v54, %v1084_v53  ;;  %v1095_v58 = vpack.c.bf16 (!%p1482_p5), %v1087_v57, %v1086_v56  ;;  %v1898_v59 = vld [vmem:[%s2246_s0 + $0x8] sm:$0xff] (!%p1482_p5)   ;;  %v1900_v61 = vld [vmem:[%s2246_s0 + $0x10] sm:$0xff] (!%p1482_p5)   ;;  %v1902_v63 = vld [vmem:[%s2246_s0 + $0x18] sm:$0xff] (!%p1482_p5)  }
 0x2fd   : > { %v1899_v60 = vld [vmem:[%s2246_s0 + $0x28] sm:$0xff] (!%p1482_p5)   ;;  %v1901_v62 = vld [vmem:[%s2246_s0 + $0x30] sm:$0xff] (!%p1482_p5)   ;;  %v1903_v0 = vld [vmem:[%s2246_s0 + $0x38] sm:$0xff] (!%p1482_p5)  }
 0x2fe   : > { %1739 = vmatpush3.bf16.msra.mxu0 %v1089_v38  ;;  %1857 = vmatpush3.bf16.msra.mxu1 %v1089_v38  ;;  %v1491_v1 = vld [vmem:[%s2251_s5] ss:$0 sm:$0xff] }
 0x2ff   : > { %1740 = vmatprep.subr.bf16.mxu0 %v1090_v42  ;;  %1850 = vmatprep.subr.bf16.mxu1 %v1090_v42 }
 0x302   : > { %1741 = vmatpush3.bf16.msra.mxu0 %v1090_v42  ;;  %1858 = vmatpush3.bf16.msra.mxu1 %v1090_v42 }
 0x303   : > { %1742 = vmatprep.subr.bf16.mxu0 %v1091_v46  ;;  %1851 = vmatprep.subr.bf16.mxu1 %v1091_v46 }
 0x306   : > { %1743 = vmatpush3.bf16.msra.mxu0 %v1091_v46  ;;  %1859 = vmatpush3.bf16.msra.mxu1 %v1091_v46 }
 0x307   : > { %1744 = vmatprep.subr.bf16.mxu0 %v1092_v49  ;;  %1852 = vmatprep.subr.bf16.mxu1 %v1092_v49 }
 0x30a   : > { %1745 = vmatpush3.bf16.msra.mxu0 %v1092_v49  ;;  %1860 = vmatpush3.bf16.msra.mxu1 %v1092_v49 }
 0x30b   : > { %1746 = vmatprep.subr.bf16.mxu0 %v1093_v52  ;;  %1853 = vmatprep.subr.bf16.mxu1 %v1093_v52 }
 0x30e   : > { %1747 = vmatpush3.bf16.msra.mxu0 %v1093_v52  ;;  %1861 = vmatpush3.bf16.msra.mxu1 %v1093_v52 }
 0x30f   : > { %1748 = vmatprep.subr.bf16.mxu0 %v1094_v55  ;;  %1854 = vmatprep.subr.bf16.mxu1 %v1094_v55 }
 0x312   : > { %1749 = vmatpush3.bf16.msra.mxu0 %v1094_v55  ;;  %1862 = vmatpush3.bf16.msra.mxu1 %v1094_v55 }
 0x313   : > { %1750 = vmatprep.subr.bf16.mxu0 %v1095_v58  ;;  %1855 = vmatprep.subr.bf16.mxu1 %v1095_v58 }
 0x316   : > { %1751 = vmatpush3.bf16.msra.mxu0 %v1095_v58  ;;  %1863 = vmatpush3.bf16.msra.mxu1 %v1095_v58 }
 0x319   : > { %1753 = vmatmul.mubr.bf16.vlgmr.msra.gmra.mrb[0].mxu0 %v1898_v59  ;;  %1761 = vmatmul.mubr.bf16.vlgmr.msra.gmra.mrb[0].mxu1 %v1899_v60 }
 0x31a   : > { %1756 = vmatprep.mubr.bf16.mxu0 %v1900_v61  ;;  %1764 = vmatprep.mubr.bf16.mxu1 %v1901_v62 }
 0x321   : > { %1757 = vmatmul.mubr.bf16.gmra.mrb[4].mxu0 %v1902_v63  ;;  %1765 = vmatmul.mubr.bf16.gmra.mrb[4].mxu1 %v1903_v0 }
 0x3ec   : > { %v1754_v2 = vpop.f32.mrb[0].mxu0  ;;  %v1762_v3 = vpop.f32.mrb[0].mxu1 }
 0x3ed   : > { %v1341_v4 = vadd.f32 %v1754_v2, %v1491_v1  ;;  %v1349_v5 = vadd.f32 %v1762_v3, %v1491_v1  ;;  %v1178_v6 = vpop.f32.mrb[1].mxu0  ;;  %v1210_v7 = vpop.f32.mrb[1].mxu1 }
 0x3ee   : > { %v1339_v8 = vadd.f32 %v1491_v1, %v1178_v6  ;;  %v1347_v9 = vadd.f32 %v1491_v1, %v1210_v7  ;;  %v1755_v10 = vpop.f32.mrb[2].mxu0  ;;  %v1763_v11 = vpop.f32.mrb[2].mxu1 }
 0x3ef   : > { %1357 = vst [vmem:[%s2252_s6 + $0x10] sm:$0xff] %v1341_v4  ;;  %1365 = vst [vmem:[%s2252_s6 + $0x50] sm:$0xff] %v1349_v5  ;;  %v1342_v12 = vadd.f32 %v1755_v10, %v1491_v1  ;;  %v1350_v13 = vadd.f32 %v1763_v11, %v1491_v1  ;;  %v1181_v14 = vpop.f32.mrb[3].mxu0  ;;  %v1213_v15 = vpop.f32.mrb[3].mxu1 }
 0x3f0   : > { %1355 = vst [vmem:[%s2252_s6] sm:$0xff] %v1339_v8  ;;  %1363 = vst [vmem:[%s2252_s6 + $0x40] sm:$0xff] %v1347_v9  ;;  %v1340_v16 = vadd.f32 %v1491_v1, %v1181_v14  ;;  %v1348_v17 = vadd.f32 %v1491_v1, %v1213_v15 }
 0x3f1   : > { %1358 = vst [vmem:[%s2252_s6 + $0x18] sm:$0xff] %v1342_v12  ;;  %1366 = vst [vmem:[%s2252_s6 + $0x58] sm:$0xff] %v1350_v13 }
 0x3f2   : > { %1356 = vst [vmem:[%s2252_s6 + $0x8] sm:$0xff] %v1340_v16  ;;  %1364 = vst [vmem:[%s2252_s6 + $0x48] sm:$0xff] %v1348_v17 }
 0x3f4   : > { %v1758_v18 = vpop.f32.mrb[4].mxu0  ;;  %v1766_v19 = vpop.f32.mrb[4].mxu1 }
 0x3f5   : > { %v1345_v20 = vadd.f32 %v1758_v18, %v1491_v1  ;;  %v1353_v21 = vadd.f32 %v1766_v19, %v1491_v1  ;;  %v1194_v22 = vpop.f32.mrb[5].mxu0  ;;  %v1226_v23 = vpop.f32.mrb[5].mxu1 }
 0x3f6   : > { %v1343_v24 = vadd.f32 %v1491_v1, %v1194_v22  ;;  %v1351_v25 = vadd.f32 %v1491_v1, %v1226_v23  ;;  %v1759_v26 = vpop.f32.mrb[6].mxu0  ;;  %v1767_v27 = vpop.f32.mrb[6].mxu1 }
 0x3f7   : > { %1361 = vst [vmem:[%s2252_s6 + $0x30] sm:$0xff] %v1345_v20  ;;  %1369 = vst [vmem:[%s2252_s6 + $0x70] sm:$0xff] %v1353_v21  ;;  %v1346_v28 = vadd.f32 %v1759_v26, %v1491_v1  ;;  %v1354_v29 = vadd.f32 %v1767_v27, %v1491_v1  ;;  %v1197_v30 = vpop.f32.mrb[7].mxu0  ;;  %v1229_v31 = vpop.f32.mrb[7].mxu1 }
 0x3f8   : > { %1359 = vst [vmem:[%s2252_s6 + $0x20] sm:$0xff] %v1343_v24  ;;  %1367 = vst [vmem:[%s2252_s6 + $0x60] sm:$0xff] %v1351_v25  ;;  %v1344_v32 = vadd.f32 %v1491_v1, %v1197_v30  ;;  %v1352_v33 = vadd.f32 %v1491_v1, %v1229_v31 }
 0x3f9   : > { %1362 = vst [vmem:[%s2252_s6 + $0x38] sm:$0xff] %v1346_v28  ;;  %1370 = vst [vmem:[%s2252_s6 + $0x78] sm:$0xff] %v1354_v29 }
 0x3fa   : > { %1360 = vst [vmem:[%s2252_s6 + $0x28] sm:$0xff] %v1344_v32  ;;  %1368 = vst [vmem:[%s2252_s6 + $0x68] sm:$0xff] %v1352_v33 }
 0x3fb PF: > { %s16_s23 = sadd.s32 1, %s1926_s23   ;;  %s2253_s21 = smov %s1922_s22 }
 0x3fc   : > { %p13_p6 = scmp.ge.s32.totalorder %s16_s23, 4   ;;  %s2254_s22 = smov %s2256_s24 }
 0x3fe   :  { %15 = sbr.rel (!%p13_p6) target bundleno = 2 (0x2), region = 117 }

// kernel: encoder_forward.2
= control target key start
LH: loop header
LB: loop body
LE: loop exit
PB: predicated region body
PF: predicated region fallthrough
CT: control target
= control target key end

     0   :  { %s2784_s21 = smov 0   ;;  %s2786_s22 = smov 0   ;;  %s3313_s0 = inlined_call_operand.vmem [shape: bf16[128,128], index: 0, kind: input, shape index: {}]   ;;  %s3314_s1 = inlined_call_operand.vmem [shape: f32[128,256], index: 1, kind: input, shape index: {}]   ;;  %s3315_s2 = inlined_call_operand.vmem [shape: f32[128,128], index: 2, kind: input, shape index: {}]   ;;  %s3316_s3 = inlined_call_operand.vmem [shape: f32[1,256], index: 3, kind: input, shape index: {}]   ;;  %s3317_s4 = inlined_call_operand.vmem [shape: f32[128,128], index: 4, kind: input, shape index: {}]   ;;  %s3318_s5 = inlined_call_operand.vmem [shape: f32[1,256], index: 5, kind: input, shape index: {}]   ;;  %s3319_s6 = inlined_call_operand.vmem [shape: f32[128,256], index: 6, kind: output, shape index: {}]  }
   0x1   :  { %s2788_s23 = smov 0  }
   0x2 LB: > { %s35_s24 = sadd.s32 1, %s2741_s22  ;;  %p2162_p0 = scmp.ge.s32.totalorder %s2745_s23, 1  ;;  %s2745_s23 = sphi %s2788_s23, %s16_s23   ;;  %s2741_s22 = sphi %s2786_s22, %s3321_s22   ;;  %s2737_s21 = sphi %s2784_s21, %s3320_s21  }
   0x3   : > { %p37_p1 = scmp.ge.s32.totalorder %s35_s24, 2  ;;  %p283_p2 = scmp.lt.s32.totalorder %s2745_s23, 3 }
   0x5   : > { %s3323_s24 = smov (%p37_p1, %s35_s24), 0  ;;  %p284_p3 = pnand %p2162_p0, %p283_p2 }
   0x6   : > { %p2163_p4 = scmp.ne.s32.totalorder (!%p284_p3), %s2737_s21, 0 }
   0x7   : > { %287 = sbr.rel (%p284_p3) target bundleno = 1094 (0x446), region = 44 }
   0xe   : > { %377 = sbr.rel (%p2163_p4) target bundleno = 816 (0x330), region = 48  ;;  %v398_v0 = vld [vmem:[%s3315_s2] sm:$0xff] (!%p2163_p4)  ;;  %v399_v1 = vld [vmem:[%s3315_s2 + $0x8] sm:$0xff] (!%p2163_p4)  ;;  %v400_v2 = vld [vmem:[%s3315_s2 + $0x10] sm:$0xff] (!%p2163_p4)  ;;  %v2747_v56 = vmov (!%p2163_p4), 0  }
   0xf   : > { %v2537_v3 = vpack.c.bf16 (!%p2163_p4), %v399_v1, %v398_v0  ;;  %v401_v4 = vld [vmem:[%s3315_s2 + $0x18] sm:$0xff] (!%p2163_p4)  ;;  %v402_v6 = vld [vmem:[%s3315_s2 + $0x20] sm:$0xff] (!%p2163_p4)  ;;  %v403_v7 = vld [vmem:[%s3315_s2 + $0x28] sm:$0xff] (!%p2163_p4) }
  0x10   : > { %v2541_v5 = vpack.c.bf16 (!%p2163_p4), %v401_v4, %v400_v2  ;;  %v2545_v8 = vpack.c.bf16 (!%p2163_p4), %v403_v7, %v402_v6  ;;  %v382_v9 = vld [vmem:[%s3314_s1] sm:$0xff] (!%p2163_p4)  ;;  %v575_v10 = vld [vmem:[%s3314_s1 + $0x8] sm:$0xff] (!%p2163_p4)  ;;  %v404_v11 = vld [vmem:[%s3315_s2 + $0x30] sm:$0xff] (!%p2163_p4) }
  0x11   : > { %2538 = vmatprep.subr.bf16.mxu0 (!%p2163_p4), %v2537_v3  ;;  %2570 = vmatprep.subr.bf16.mxu1 (!%p2163_p4), %v2537_v3  ;;  %v405_v12 = vld [vmem:[%s3315_s2 + $0x38] sm:$0xff] (!%p2163_p4)  ;;  %v406_v14 = vld [vmem:[%s3315_s2 + $0x40] sm:$0xff] (!%p2163_p4)  ;;  %v407_v15 = vld [vmem:[%s3315_s2 + $0x48] sm:$0xff] (!%p2163_p4) }
  0x12   : > { %2540 = vmatpush3.bf16.msra.mxu0 (!%p2163_p4), %v2537_v3  ;;  %2572 = vmatpush3.bf16.msra.mxu1 (!%p2163_p4), %v2537_v3  ;;  %v2549_v13 = vpack.c.bf16 (!%p2163_p4), %v405_v12, %v404_v11  ;;  %v2553_v16 = vpack.c.bf16 (!%p2163_p4), %v407_v15, %v406_v14  ;;  %v408_v17 = vld [vmem:[%s3315_s2 + $0x50] sm:$0xff] (!%p2163_p4)  ;;  %v409_v18 = vld [vmem:[%s3315_s2 + $0x58] sm:$0xff] (!%p2163_p4)  ;;  %v410_v19 = vld [vmem:[%s3315_s2 + $0x60] sm:$0xff] (!%p2163_p4) }
  0x13   : > { %2542 = vmatprep.subr.bf16.mxu0 (!%p2163_p4), %v2541_v5  ;;  %2574 = vmatprep.subr.bf16.mxu1 (!%p2163_p4), %v2541_v5  ;;  %v411_v20 = vld [vmem:[%s3315_s2 + $0x68] sm:$0xff] (!%p2163_p4)  ;;  %v2557_v21 = vpack.c.bf16 (!%p2163_p4), %v409_v18, %v408_v17  ;;  %v412_v23 = vld [vmem:[%s3315_s2 + $0x70] sm:$0xff] (!%p2163_p4)  ;;  %v413_v24 = vld [vmem:[%s3315_s2 + $0x78] sm:$0xff] (!%p2163_p4) }
  0x14   : > { %2345 = vmatprep.mubr.f32.mxu0 (!%p2163_p4), %v382_v9  ;;  %2401 = vmatprep.mubr.f32.mxu1 (!%p2163_p4), %v575_v10  ;;  %v2561_v22 = vpack.c.bf16 (!%p2163_p4), %v411_v20, %v410_v19  ;;  %v2565_v25 = vpack.c.bf16 (!%p2163_p4), %v413_v24, %v412_v23  ;;  %v383_v26 = vld [vmem:[%s3314_s1 + $0x10] sm:$0xff] (!%p2163_p4)  ;;  %v576_v27 = vld [vmem:[%s3314_s1 + $0x18] sm:$0xff] (!%p2163_p4)  ;;  %v384_v28 = vld [vmem:[%s3314_s1 + $0x20] sm:$0xff] (!%p2163_p4) }
  0x15   : > { %v577_v29 = vld [vmem:[%s3314_s1 + $0x28] sm:$0xff]  ;;  %v385_v30 = vld [vmem:[%s3314_s1 + $0x30] sm:$0xff]  ;;  %v578_v31 = vld [vmem:[%s3314_s1 + $0x38] sm:$0xff] }
  0x16   : > { %2544 = vmatpush3.bf16.msra.mxu0 %v2541_v5  ;;  %2576 = vmatpush3.bf16.msra.mxu1 %v2541_v5  ;;  %v386_v32 = vld [vmem:[%s3314_s1 + $0x40] sm:$0xff]  ;;  %v579_v33 = vld [vmem:[%s3314_s1 + $0x48] sm:$0xff]  ;;  %v387_v34 = vld [vmem:[%s3314_s1 + $0x50] sm:$0xff] }
  0x17   : > { %2546 = vmatprep.subr.bf16.mxu0 %v2545_v8  ;;  %2578 = vmatprep.subr.bf16.mxu1 %v2545_v8  ;;  %v580_v35 = vld [vmem:[%s3314_s1 + $0x58] sm:$0xff]  ;;  %v388_v36 = vld [vmem:[%s3314_s1 + $0x60] sm:$0xff]  ;;  %v581_v37 = vld [vmem:[%s3314_s1 + $0x68] sm:$0xff] }
  0x18   : > { %v389_v38 = vld [vmem:[%s3314_s1 + $0x70] sm:$0xff]  ;;  %v582_v39 = vld [vmem:[%s3314_s1 + $0x78] sm:$0xff]  ;;  %v390_v40 = vld [vmem:[%s3314_s1 + $0x80] sm:$0xff] }
  0x19   : > { %v583_v41 = vld [vmem:[%s3314_s1 + $0x88] sm:$0xff]  ;;  %v391_v42 = vld [vmem:[%s3314_s1 + $0x90] sm:$0xff]  ;;  %v584_v43 = vld [vmem:[%s3314_s1 + $0x98] sm:$0xff] }
  0x1a   : > { %2548 = vmatpush3.bf16.msra.mxu0 %v2545_v8  ;;  %2580 = vmatpush3.bf16.msra.mxu1 %v2545_v8  ;;  %v392_v44 = vld [vmem:[%s3314_s1 + $0xa0] sm:$0xff]  ;;  %v585_v45 = vld [vmem:[%s3314_s1 + $0xa8] sm:$0xff]  ;;  %v393_v46 = vld [vmem:[%s3314_s1 + $0xb0] sm:$0xff] }
  0x1b   : > { %2550 = vmatprep.subr.bf16.mxu0 %v2549_v13  ;;  %2582 = vmatprep.subr.bf16.mxu1 %v2549_v13  ;;  %v586_v47 = vld [vmem:[%s3314_s1 + $0xb8] sm:$0xff]  ;;  %v394_v48 = vld [vmem:[%s3314_s1 + $0xc0] sm:$0xff]  ;;  %v587_v49 = vld [vmem:[%s3314_s1 + $0xc8] sm:$0xff] }
  0x1c   : > { %v395_v50 = vld [vmem:[%s3314_s1 + $0xd0] sm:$0xff]  ;;  %v588_v51 = vld [vmem:[%s3314_s1 + $0xd8] sm:$0xff]  ;;  %v396_v52 = vld [vmem:[%s3314_s1 + $0xe0] sm:$0xff] }
  0x1d   : > { %v589_v53 = vld [vmem:[%s3314_s1 + $0xe8] sm:$0xff]  ;;  %v397_v54 = vld [vmem:[%s3314_s1 + $0xf0] sm:$0xff]  ;;  %v590_v55 = vld [vmem:[%s3314_s1 + $0xf8] sm:$0xff] }
  0x1e   : > { %2552 = vmatpush3.bf16.msra.mxu0 %v2549_v13  ;;  %2584 = vmatpush3.bf16.msra.mxu1 %v2549_v13  ;;  %v1224_v57 = vld [vmem:[%s3317_s4] sm:$0xff]  ;;  %v1225_v58 = vld [vmem:[%s3317_s4 + $0x8] sm:$0xff]  ;;  %v1226_v59 = vld [vmem:[%s3317_s4 + $0x10] sm:$0xff] }
  0x1f   : > { %2554 = vmatprep.subr.bf16.mxu0 %v2553_v16  ;;  %2586 = vmatprep.subr.bf16.mxu1 %v2553_v16  ;;  %v2959_v60 = vpack.c.bf16 %v1225_v58, %v1224_v57  ;;  %v1227_v61 = vld [vmem:[%s3317_s4 + $0x18] sm:$0xff]  ;;  %v1228_v63 = vld [vmem:[%s3317_s4 + $0x20] sm:$0xff]  ;;  %v1229_v0 = vld [vmem:[%s3317_s4 + $0x28] sm:$0xff] }
  0x20   : > { %v2964_v62 = vpack.c.bf16 %v1227_v61, %v1226_v59  ;;  %v2975_v1 = vpack.c.bf16 %v1229_v0, %v1228_v63  ;;  %v1230_v2 = vld [vmem:[%s3317_s4 + $0x30] sm:$0xff]  ;;  %v1231_v3 = vld [vmem:[%s3317_s4 + $0x38] sm:$0xff]  ;;  %v1232_v5 = vld [vmem:[%s3317_s4 + $0x40] sm:$0xff] }
  0x21   : > { %v2985_v4 = vpack.c.bf16 %v1231_v3, %v1230_v2  ;;  %v1233_v6 = vld [vmem:[%s3317_s4 + $0x48] sm:$0xff]  ;;  %v2707_v57 = vld [vmem:[%s3313_s0] sm:$0xff]   ;;  %v2709_v59 = vld [vmem:[%s3313_s0 + $0x10] sm:$0xff]  }
  0x22   : > { %2556 = vmatpush3.bf16.msra.mxu0 %v2553_v16  ;;  %2588 = vmatpush3.bf16.msra.mxu1 %v2553_v16  ;;  %v2995_v7 = vpack.c.bf16 %v1233_v6, %v1232_v5  ;;  %v2708_v58 = vld [vmem:[%s3313_s0 + $0x8] sm:$0xff]   ;;  %v2710_v61 = vld [vmem:[%s3313_s0 + $0x18] sm:$0xff]   ;;  %v2711_v63 = vld [vmem:[%s3313_s0 + $0x20] sm:$0xff]  }
  0x23   : > { %2558 = vmatprep.subr.bf16.mxu0 %v2557_v21  ;;  %2590 = vmatprep.subr.bf16.mxu1 %v2557_v21  ;;  %v2712_v0 = vld [vmem:[%s3313_s0 + $0x28] sm:$0xff]   ;;  %v2713_v2 = vld [vmem:[%s3313_s0 + $0x30] sm:$0xff]   ;;  %v2714_v3 = vld [vmem:[%s3313_s0 + $0x38] sm:$0xff]  }
  0x24   : > { %v1234_v5 = vld [vmem:[%s3317_s4 + $0x50] sm:$0xff]  ;;  %v1235_v6 = vld [vmem:[%s3317_s4 + $0x58] sm:$0xff] }
  0x26   : > { %2560 = vmatpush3.bf16.msra.mxu0 %v2557_v21  ;;  %2592 = vmatpush3.bf16.msra.mxu1 %v2557_v21 }
  0x27   : > { %2562 = vmatprep.subr.bf16.mxu0 %v2561_v22  ;;  %2594 = vmatprep.subr.bf16.mxu1 %v2561_v22 }
  0x2a   : > { %2564 = vmatpush3.bf16.msra.mxu0 %v2561_v22  ;;  %2596 = vmatpush3.bf16.msra.mxu1 %v2561_v22 }
  0x2b   : > { %2566 = vmatprep.subr.bf16.mxu0 %v2565_v25  ;;  %2598 = vmatprep.subr.bf16.mxu1 %v2565_v25 }
  0x2e   : > { %2568 = vmatpush3.bf16.msra.mxu0 %v2565_v25  ;;  %2600 = vmatpush3.bf16.msra.mxu1 %v2565_v25 }
  0x2f   : > { %2602 = vmatprep.subr.bf16.mxu1 %v2959_v60 }
  0x31   : > { %2346 = vmatmul.mubr.f32.vlgmr.msra.gmra.mrb[0].mxu0 %v383_v26  ;;  %2402 = vmatmul.mubr.f32.vlgmr.msra.gmra.mrb[0].mxu1 %v576_v27 }
  0x32   : > { %2348 = vmatprep.mubr.f32.mxu0 %v384_v28  ;;  %2404 = vmatprep.mubr.f32.mxu1 %v577_v29 }
  0x33   : > { %2604 = vmatpush3.bf16.msra.mxu1 %v2959_v60 }
  0x34   : > { %2606 = vmatprep.subr.bf16.mxu1 %v2964_v62 }
  0x35   : > { %2349 = vmatmul.mubr.f32.gmra.mrb[2].mxu0 %v385_v30  ;;  %2405 = vmatmul.mubr.f32.gmra.mrb[2].mxu1 %v578_v31 }
  0x36   : > { %2351 = vmatprep.mubr.f32.mxu0 %v386_v32  ;;  %2407 = vmatprep.mubr.f32.mxu1 %v579_v33 }
  0x37   : > { %2608 = vmatpush3.bf16.msra.mxu1 %v2964_v62 }
  0x38   : > { %2610 = vmatprep.subr.bf16.mxu1 %v2975_v1 }
  0x39   : > { %2352 = vmatmul.mubr.f32.gmra.mrb[4].mxu0 %v387_v34  ;;  %2408 = vmatmul.mubr.f32.gmra.mrb[4].mxu1 %v580_v35 }
  0x3a   : > { %2354 = vmatprep.mubr.f32.mxu0 %v388_v36  ;;  %2410 = vmatprep.mubr.f32.mxu1 %v581_v37 }
  0x3b   : > { %2612 = vmatpush3.bf16.msra.mxu1 %v2975_v1 }
  0x3c   : > { %2614 = vmatprep.subr.bf16.mxu1 %v2985_v4 }
  0x3d   : > { %2355 = vmatmul.mubr.f32.gmra.mrb[6].mxu0 %v389_v38  ;;  %2411 = vmatmul.mubr.f32.gmra.mrb[6].mxu1 %v582_v39 }
  0x3e   : > { %2357 = vmatprep.mubr.f32.mxu0 %v390_v40  ;;  %2413 = vmatprep.mubr.f32.mxu1 %v583_v41 }
  0x3f   : > { %2616 = vmatpush3.bf16.msra.mxu1 %v2985_v4 }
  0x40   : > { %2618 = vmatprep.subr.bf16.mxu1 %v2995_v7 }
  0x41   : > { %2358 = vmatmul.mubr.f32.gmra.mrb[8].mxu0 %v391_v42  ;;  %2414 = vmatmul.mubr.f32.gmra.mrb[8].mxu1 %v584_v43 }
  0x42   : > { %2360 = vmatprep.mubr.f32.mxu0 %v392_v44  ;;  %2416 = vmatprep.mubr.f32.mxu1 %v585_v45 }
  0x43   : > { %2620 = vmatpush3.bf16.msra.mxu1 %v2995_v7 }
  0x45   : > { %2361 = vmatmul.mubr.f32.gmra.mrb[10].mxu0 %v393_v46  ;;  %2417 = vmatmul.mubr.f32.gmra.mrb[10].mxu1 %v586_v47 }
  0x46   : > { %2363 = vmatprep.mubr.f32.mxu0 %v394_v48  ;;  %2419 = vmatprep.mubr.f32.mxu1 %v587_v49 }
  0x49   : > { %2364 = vmatmul.mubr.f32.gmra.mrb[12].mxu0 %v395_v50  ;;  %2420 = vmatmul.mubr.f32.gmra.mrb[12].mxu1 %v588_v51 }
  0x4a   : > { %2366 = vmatprep.mubr.f32.mxu0 %v396_v52  ;;  %2422 = vmatprep.mubr.f32.mxu1 %v589_v53 }
  0x4d   : > { %2367 = vmatmul.mubr.f32.gmra.mrb[14].mxu0 %v397_v54  ;;  %2423 = vmatmul.mubr.f32.gmra.mrb[14].mxu1 %v590_v55 }
  0x4e   : > { %880 = vmatprep.mubr.bf16.mxu0 %v2747_v56 }
 0x104   : > { %v2347_v8 = vpop.f32.mrb[0].mxu0  ;;  %v2403_v9 = vpop.f32.mrb[0].mxu1 }
 0x105   : > { %v480_v10 = vpop.f32.mrb[1].mxu0  ;;  %v673_v11 = vpop.f32.mrb[1].mxu1 }
 0x106   : > { %v559_v12 = vpack.c.bf16 %v2347_v8, %v480_v10  ;;  %v752_v13 = vpack.c.bf16 %v2403_v9, %v673_v11  ;;  %v3037_v8 = vpack.c.bf16 %v1235_v6, %v1234_v5  ;;  %v1237_v9 = vld [vmem:[%s3317_s4 + $0x68] sm:$0xff]  ;;  %v1238_v11 = vld [vmem:[%s3317_s4 + $0x70] sm:$0xff] }
 0x108   : > { %v2350_v14 = vpop.f32.mrb[2].mxu0  ;;  %v2406_v15 = vpop.f32.mrb[2].mxu1  ;;  %848 = vmatprep.subr.bf16.mxu0 %v752_v13  ;;  %2622 = vmatprep.subr.bf16.mxu1 %v3037_v8 }
 0x109   : > { %v490_v16 = vpop.f32.mrb[3].mxu0  ;;  %v683_v17 = vpop.f32.mrb[3].mxu1  ;;  %849 = vmatpush1.bf16.msra.mxu0 %v559_v12  ;;  %2624 = vmatpush3.bf16.msra.mxu1 %v3037_v8  ;;  %v1239_v12 = vld [vmem:[%s3317_s4 + $0x78] sm:$0xff] }
 0x10a   : > { %v560_v18 = vpack.c.bf16 %v2350_v14, %v490_v16  ;;  %v753_v19 = vpack.c.bf16 %v2406_v15, %v683_v17  ;;  %v3057_v13 = vpack.c.bf16 %v1239_v12, %v1238_v11  ;;  %v1150_v14 = vlaneseq  ;;  %v3068_v17 = vld [vmem:[%s3316_s3] sm:$0x3] }
 0x10c   : > { %v2353_v20 = vpop.f32.mrb[4].mxu0  ;;  %v2409_v21 = vpop.f32.mrb[4].mxu1  ;;  %850 = vmatprep.subr.bf16.mxu0 %v753_v19  ;;  %v3062_v15 = vshrl.u32 %v1150_v14, 7 }
 0x10d   : > { %v500_v22 = vpop.f32.mrb[5].mxu0  ;;  %v693_v23 = vpop.f32.mrb[5].mxu1  ;;  %851 = vmatpush1.bf16.msra.mxu0 %v560_v18 }
 0x10e   : > { %v561_v24 = vpack.c.bf16 %v2353_v20, %v500_v22  ;;  %v754_v25 = vpack.c.bf16 %v2409_v21, %v693_v23  ;;  %v1152_v16 = vsub.s32 0, %v3062_v15 }
 0x110   : > { %v2356_v26 = vpop.f32.mrb[6].mxu0  ;;  %v2412_v27 = vpop.f32.mrb[6].mxu1  ;;  %852 = vmatprep.subr.bf16.mxu0 %v754_v25  ;;  %v3071_v18 = vrot.slane %v3068_v17, %v1152_v16 }
 0x111   : > { %v510_v28 = vpop.f32.mrb[7].mxu0  ;;  %v703_v29 = vpop.f32.mrb[7].mxu1  ;;  %853 = vmatpush1.bf16.msra.mxu0 %v561_v24 }
 0x112   : > { %v562_v30 = vpack.c.bf16 %v2356_v26, %v510_v28  ;;  %v755_v31 = vpack.c.bf16 %v2412_v27, %v703_v29 }
 0x114   : > { %v2359_v32 = vpop.f32.mrb[8].mxu0  ;;  %v2415_v33 = vpop.f32.mrb[8].mxu1  ;;  %854 = vmatprep.subr.bf16.mxu0 %v755_v31 }
 0x115   : > { %v520_v34 = vpop.f32.mrb[9].mxu0  ;;  %v713_v35 = vpop.f32.mrb[9].mxu1  ;;  %855 = vmatpush1.bf16.msra.mxu0 %v562_v30 }
 0x116   : > { %v563_v36 = vpack.c.bf16 %v2359_v32, %v520_v34  ;;  %v756_v37 = vpack.c.bf16 %v2415_v33, %v713_v35 }
 0x118   : > { %v2362_v38 = vpop.f32.mrb[10].mxu0  ;;  %v2418_v39 = vpop.f32.mrb[10].mxu1  ;;  %856 = vmatprep.subr.bf16.mxu0 %v756_v37 }
 0x119   : > { %v530_v40 = vpop.f32.mrb[11].mxu0  ;;  %v723_v41 = vpop.f32.mrb[11].mxu1  ;;  %857 = vmatpush1.bf16.msra.mxu0 %v563_v36 }
 0x11a   : > { %v564_v42 = vpack.c.bf16 %v2362_v38, %v530_v40  ;;  %v757_v43 = vpack.c.bf16 %v2418_v39, %v723_v41 }
 0x11c   : > { %v2365_v44 = vpop.f32.mrb[12].mxu0  ;;  %v2421_v45 = vpop.f32.mrb[12].mxu1  ;;  %858 = vmatprep.subr.bf16.mxu0 %v757_v43 }
 0x11d   : > { %v540_v46 = vpop.f32.mrb[13].mxu0  ;;  %v733_v47 = vpop.f32.mrb[13].mxu1  ;;  %859 = vmatpush1.bf16.msra.mxu0 %v564_v42 }
 0x11e   : > { %v565_v48 = vpack.c.bf16 %v2365_v44, %v540_v46  ;;  %v758_v49 = vpack.c.bf16 %v2421_v45, %v733_v47 }
 0x120   : > { %v2368_v50 = vpop.f32.mrb[14].mxu0  ;;  %v2424_v51 = vpop.f32.mrb[14].mxu1  ;;  %860 = vmatprep.subr.bf16.mxu0 %v758_v49 }
 0x121   : > { %v550_v52 = vpop.f32.mrb[15].mxu0  ;;  %v743_v53 = vpop.f32.mrb[15].mxu1  ;;  %861 = vmatpush1.bf16.msra.mxu0 %v565_v48 }
 0x122   : > { %v566_v54 = vpack.c.bf16 %v2368_v50, %v550_v52  ;;  %v759_v55 = vpack.c.bf16 %v2424_v51, %v743_v53 }
 0x124   : > { %862 = vmatprep.subr.bf16.mxu0 %v759_v55 }
 0x125   : > { %863 = vmatpush1.bf16.msra.mxu0 %v566_v54 }
 0x128   : > { %881 = vmatmul.mubr.bf16.vlgmr.msra.gmra.mrb[16].mxu0 %v2707_v57 }
 0x129   : > { %890 = vmatprep.mubr.bf16.mxu0 %v2747_v56 }
 0x130   : > { %891 = vmatmul.mubr.bf16.gmra.mrb[20].mxu0 %v2708_v58 }
 0x131   : > { %900 = vmatprep.mubr.bf16.mxu0 %v2747_v56 }
 0x138   : > { %901 = vmatmul.mubr.bf16.gmra.mrb[24].mxu0 %v2709_v59 }
 0x139   : > { %910 = vmatprep.mubr.bf16.mxu0 %v2747_v56 }
 0x140   : > { %911 = vmatmul.mubr.bf16.gmra.mrb[28].mxu0 %v2710_v61 }
 0x141   : > { %920 = vmatprep.mubr.bf16.mxu0 %v2747_v56 }
 0x148   : > { %921 = vmatmul.mubr.bf16.gmra.mrb[32].mxu0 %v2711_v63 }
 0x149   : > { %930 = vmatprep.mubr.bf16.mxu0 %v2747_v56 }
 0x150   : > { %931 = vmatmul.mubr.bf16.gmra.mrb[36].mxu0 %v2712_v0 }
 0x151   : > { %940 = vmatprep.mubr.bf16.mxu0 %v2747_v56 }
 0x158   : > { %941 = vmatmul.mubr.bf16.gmra.mrb[40].mxu0 %v2713_v2 }
 0x159   : > { %950 = vmatprep.mubr.bf16.mxu0 %v2747_v56  ;;  %v1236_v56 = vld [vmem:[%s3317_s4 + $0x60] sm:$0xff] }
 0x15a   : > { %v3047_v10 = vpack.c.bf16 %v1237_v9, %v1236_v56 }
 0x15c   : > { %2626 = vmatprep.subr.bf16.mxu1 %v3047_v10 }
 0x15d   : > { %2628 = vmatpush3.bf16.msra.mxu1 %v3047_v10 }
 0x15e   : > { %2630 = vmatprep.subr.bf16.mxu1 %v3057_v13 }
 0x160   : > { %951 = vmatmul.mubr.bf16.gmra.mrb[44].mxu0 %v2714_v3 }
 0x161   : > { %2632 = vmatpush3.bf16.msra.mxu1 %v3057_v13 }
 0x162   : > { %2634 = vmatprep.subr.bf16.mxu1 %v2959_v60 }
 0x1fb   : > { %v882_v19 = vpop.f32.mrb[16].mxu0 }
 0x1fc   : > { %v3073_v20 = vpop.f32.mrb[17].mxu0  ;;  %v1160_v21 = vadd.f32 %v3071_v18, %v882_v19 }
 0x1fd   : > { %v886_v22 = vpop.f32.mrb[18].mxu0 }
 0x1fe   : > { %v3076_v23 = vpop.f32.mrb[19].mxu0  ;;  %v1192_v24 = vmax.f32 %v1160_v21, 0.0  ;;  %v1162_v25 = vadd.f32 %v3071_v18, %v886_v22 }
 0x200   : > { %2457 = vmatprep.mubr.f32.mxu1 %v1192_v24  ;;  %v1194_v26 = vmax.f32 %v1162_v25, 0.0 }
 0x202   : > { %2458 = vmatmul.mubr.f32.vlgmr.msra.gmra.mrb[16].mxu1 %v1194_v26 }
 0x203   : > { %v892_v27 = vpop.f32.mrb[20].mxu0  ;;  %2636 = vmatpush3.bf16.msra.mxu1 %v2959_v60 }
 0x204   : > { %v3080_v28 = vpop.f32.mrb[21].mxu0  ;;  %v1164_v29 = vadd.f32 %v3071_v18, %v892_v27  ;;  %2638 = vmatprep.subr.bf16.mxu1 %v2964_v62 }
 0x205   : > { %v896_v30 = vpop.f32.mrb[22].mxu0 }
 0x206   : > { %v3084_v31 = vpop.f32.mrb[23].mxu0  ;;  %v1196_v32 = vmax.f32 %v1164_v29, 0.0  ;;  %v1166_v33 = vadd.f32 %v3071_v18, %v896_v30 }
 0x207   : > { %2640 = vmatpush3.bf16.msra.mxu1 %v2964_v62 }
 0x208   : > { %2460 = vmatprep.mubr.f32.mxu1 %v1196_v32  ;;  %v1198_v34 = vmax.f32 %v1166_v33, 0.0  ;;  %2642 = vmatprep.subr.bf16.mxu1 %v2975_v1 }
 0x20a   : > { %2461 = vmatmul.mubr.f32.gmra.mrb[18].mxu1 %v1198_v34 }
 0x20b   : > { %v902_v60 = vpop.f32.mrb[24].mxu0  ;;  %2644 = vmatpush3.bf16.msra.mxu1 %v2975_v1 }
 0x20c   : > { %v3090_v35 = vpop.f32.mrb[25].mxu0  ;;  %v1168_v36 = vadd.f32 %v3071_v18, %v902_v60  ;;  %2646 = vmatprep.subr.bf16.mxu1 %v2985_v4 }
 0x20d   : > { %v906_v37 = vpop.f32.mrb[26].mxu0 }
 0x20e   : > { %v3094_v38 = vpop.f32.mrb[27].mxu0  ;;  %v1200_v39 = vmax.f32 %v1168_v36, 0.0  ;;  %v1170_v62 = vadd.f32 %v3071_v18, %v906_v37 }
 0x20f   : > { %2648 = vmatpush3.bf16.msra.mxu1 %v2985_v4 }
 0x210   : > { %2463 = vmatprep.mubr.f32.mxu1 %v1200_v39  ;;  %v1202_v40 = vmax.f32 %v1170_v62, 0.0  ;;  %2650 = vmatprep.subr.bf16.mxu1 %v2995_v7 }
 0x212   : > { %2464 = vmatmul.mubr.f32.gmra.mrb[20].mxu1 %v1202_v40 }
 0x213   : > { %v912_v1 = vpop.f32.mrb[28].mxu0  ;;  %2652 = vmatpush3.bf16.msra.mxu1 %v2995_v7 }
 0x214   : > { %v3100_v41 = vpop.f32.mrb[29].mxu0  ;;  %v1172_v42 = vadd.f32 %v3071_v18, %v912_v1  ;;  %2654 = vmatprep.subr.bf16.mxu1 %v3037_v8 }
 0x215   : > { %v916_v43 = vpop.f32.mrb[30].mxu0 }
 0x216   : > { %v3104_v44 = vpop.f32.mrb[31].mxu0  ;;  %v1204_v45 = vmax.f32 %v1172_v42, 0.0  ;;  %v1174_v4 = vadd.f32 %v3071_v18, %v916_v43 }
 0x217   : > { %2656 = vmatpush3.bf16.msra.mxu1 %v3037_v8  ;;  %v1156_v8 = vsub.s32 1, %v3062_v15 }
 0x218   : > { %2466 = vmatprep.mubr.f32.mxu1 %v1204_v45  ;;  %v1206_v46 = vmax.f32 %v1174_v4, 0.0  ;;  %2658 = vmatprep.subr.bf16.mxu1 %v3047_v10 }
 0x219   : > { %v1157_v12 = vrot.slane %v3068_v17, %v1156_v8 }
 0x21a   : > { %2467 = vmatmul.mubr.f32.gmra.mrb[22].mxu1 %v1206_v46 }
 0x21b   : > { %v922_v7 = vpop.f32.mrb[32].mxu0  ;;  %2660 = vmatpush3.bf16.msra.mxu1 %v3047_v10  ;;  %v1161_v21 = vadd.f32 %v1157_v12, %v3073_v20  ;;  %v1163_v26 = vadd.f32 %v1157_v12, %v3076_v23  ;;  %v1165_v29 = vadd.f32 %v1157_v12, %v3080_v28  ;;  %v1167_v30 = vadd.f32 %v1157_v12, %v3084_v31 }
 0x21c   : > { %v3110_v47 = vpop.f32.mrb[33].mxu0  ;;  %v1176_v48 = vadd.f32 %v3071_v18, %v922_v7  ;;  %2662 = vmatprep.subr.bf16.mxu1 %v3057_v13  ;;  %v1169_v33 = vadd.f32 %v1157_v12, %v3090_v35  ;;  %v1173_v60 = vadd.f32 %v1157_v12, %v3100_v41  ;;  %v1175_v28 = vadd.f32 %v1157_v12, %v3104_v44 }
 0x21d   : > { %v926_v49 = vpop.f32.mrb[34].mxu0  ;;  %v1193_v27 = vmax.f32 %v1161_v21, 0.0  ;;  %v1195_v17 = vmax.f32 %v1163_v26, 0.0  ;;  %v1197_v32 = vmax.f32 %v1165_v29, 0.0  ;;  %v1199_v20 = vmax.f32 %v1167_v30, 0.0 }
 0x21e   : > { %v3114_v50 = vpop.f32.mrb[35].mxu0  ;;  %v1208_v51 = vmax.f32 %v1176_v48, 0.0  ;;  %v1178_v52 = vadd.f32 %v3071_v18, %v926_v49  ;;  %v1201_v34 = vmax.f32 %v1169_v33, 0.0  ;;  %v1205_v36 = vmax.f32 %v1173_v60, 0.0 }
 0x21f   : > { %2664 = vmatpush3.bf16.msra.mxu1 %v3057_v13  ;;  %v1177_v37 = vadd.f32 %v1157_v12, %v3110_v47  ;;  %v1207_v31 = vmax.f32 %v1175_v28, 0.0  ;;  %v1179_v35 = vadd.f32 %v1157_v12, %v3114_v50 }
 0x220   : > { %2469 = vmatprep.mubr.f32.mxu1 %v1208_v51  ;;  %v1210_v53 = vmax.f32 %v1178_v52, 0.0 }
 0x221   : > { %v1209_v39 = vmax.f32 %v1177_v37, 0.0 }
 0x222   : > { %2470 = vmatmul.mubr.f32.gmra.mrb[24].mxu1 %v1210_v53 }
 0x223   : > { %v932_v54 = vpop.f32.mrb[36].mxu0 }
 0x224   : > { %v934_v55 = vpop.f32.mrb[37].mxu0  ;;  %v1180_v57 = vadd.f32 %v3071_v18, %v932_v54 }
 0x225   : > { %v936_v58 = vpop.f32.mrb[38].mxu0  ;;  %v1181_v62 = vadd.f32 %v1157_v12, %v934_v55 }
 0x226   : > { %v938_v59 = vpop.f32.mrb[39].mxu0  ;;  %v1212_v61 = vmax.f32 %v1180_v57, 0.0  ;;  %v1182_v63 = vadd.f32 %v3071_v18, %v936_v58 }
 0x227   : > { %v1183_v40 = vadd.f32 %v1157_v12, %v938_v59  ;;  %v1213_v1 = vmax.f32 %v1181_v62, 0.0 }
 0x228   : > { %2472 = vmatprep.mubr.f32.mxu1 %v1212_v61  ;;  %v1214_v0 = vmax.f32 %v1182_v63, 0.0 }
 0x229   : > { %v1215_v42 = vmax.f32 %v1183_v40, 0.0 }
 0x22a   : > { %2473 = vmatmul.mubr.f32.gmra.mrb[26].mxu1 %v1214_v0 }
 0x22b   : > { %v942_v2 = vpop.f32.mrb[40].mxu0 }
 0x22c   : > { %v944_v3 = vpop.f32.mrb[41].mxu0  ;;  %v1184_v5 = vadd.f32 %v3071_v18, %v942_v2 }
 0x22d   : > { %v946_v6 = vpop.f32.mrb[42].mxu0  ;;  %v1185_v41 = vadd.f32 %v1157_v12, %v944_v3 }
 0x22e   : > { %v948_v56 = vpop.f32.mrb[43].mxu0  ;;  %v1216_v9 = vmax.f32 %v1184_v5, 0.0  ;;  %v1186_v10 = vadd.f32 %v3071_v18, %v946_v6 }
 0x22f   : > { %v1187_v43 = vadd.f32 %v1157_v12, %v948_v56  ;;  %v1217_v44 = vmax.f32 %v1185_v41, 0.0 }
 0x230   : > { %2475 = vmatprep.mubr.f32.mxu1 %v1216_v9  ;;  %v1218_v11 = vmax.f32 %v1186_v10, 0.0 }
 0x231   : > { %v1219_v4 = vmax.f32 %v1187_v43, 0.0 }
 0x232   : > { %2476 = vmatmul.mubr.f32.gmra.mrb[28].mxu1 %v1218_v11 }
 0x233   : > { %v952_v13 = vpop.f32.mrb[44].mxu0 }
 0x234   : > { %v954_v14 = vpop.f32.mrb[45].mxu0  ;;  %v1188_v16 = vadd.f32 %v3071_v18, %v952_v13 }
 0x235   : > { %v956_v19 = vpop.f32.mrb[46].mxu0  ;;  %v1189_v45 = vadd.f32 %v1157_v12, %v954_v14 }
 0x236   : > { %v958_v22 = vpop.f32.mrb[47].mxu0  ;;  %v1220_v24 = vmax.f32 %v1188_v16, 0.0  ;;  %v1190_v15 = vadd.f32 %v3071_v18, %v956_v19  ;;  %v1171_v18 = vadd.f32 %v1157_v12, %v3094_v38  ;;  %v1211_v38 = vmax.f32 %v1179_v35, 0.0 }
 0x237   : > { %v1191_v46 = vadd.f32 %v1157_v12, %v958_v22  ;;  %v1221_v7 = vmax.f32 %v1189_v45, 0.0 }
 0x238   : > { %2478 = vmatprep.mubr.f32.mxu1 %v1220_v24  ;;  %v1222_v25 = vmax.f32 %v1190_v15, 0.0  ;;  %v1203_v23 = vmax.f32 %v1171_v18, 0.0 }
 0x239   : > { %v1223_v47 = vmax.f32 %v1191_v46, 0.0 }
 0x23a   : > { %2479 = vmatmul.mubr.f32.gmra.mrb[30].mxu1 %v1222_v25 }
 0x23b   : > { %2513 = vmatprep.mubr.f32.mxu1 %v1193_v27 }
 0x23e   : > { %2514 = vmatmul.mubr.f32.vlgmr.msra.gmra.mrb[32].mxu1 %v1195_v17 }
 0x23f   : > { %2516 = vmatprep.mubr.f32.mxu1 %v1197_v32 }
 0x242   : > { %2517 = vmatmul.mubr.f32.gmra.mrb[34].mxu1 %v1199_v20 }
 0x243   : > { %2519 = vmatprep.mubr.f32.mxu1 %v1201_v34 }
 0x246   : > { %2520 = vmatmul.mubr.f32.gmra.mrb[36].mxu1 %v1203_v23 }
 0x247   : > { %2522 = vmatprep.mubr.f32.mxu1 %v1205_v36 }
 0x24a   : > { %2523 = vmatmul.mubr.f32.gmra.mrb[38].mxu1 %v1207_v31 }
 0x24b   : > { %2525 = vmatprep.mubr.f32.mxu1 %v1209_v39 }
 0x24e   : > { %2526 = vmatmul.mubr.f32.gmra.mrb[40].mxu1 %v1211_v38 }
 0x24f   : > { %2528 = vmatprep.mubr.f32.mxu1 %v1213_v1 }
 0x252   : > { %2529 = vmatmul.mubr.f32.gmra.mrb[42].mxu1 %v1215_v42 }
 0x253   : > { %2531 = vmatprep.mubr.f32.mxu1 %v1217_v44 }
 0x256   : > { %2532 = vmatmul.mubr.f32.gmra.mrb[44].mxu1 %v1219_v4 }
 0x257   : > { %2534 = vmatprep.mubr.f32.mxu1 %v1221_v7 }
 0x25a   : > { %2535 = vmatmul.mubr.f32.gmra.mrb[46].mxu1 %v1223_v47 }
 0x2d5   : > { %v2459_v48 = vpop.f32.mrb[16].mxu1 }
 0x2d6   : > { %1386 = vst [vmem:[#allocation2 + $0x10] sm:$0xff] %v2459_v48  ;;  %v1306_v49 = vpop.f32.mrb[17].mxu1 }
 0x2d7   : > { %1385 = vst [vmem:[#allocation2] sm:$0xff] %v1306_v49 }
 0x2dd   : > { %v2462_v50 = vpop.f32.mrb[18].mxu1 }
 0x2de   : > { %1388 = vst [vmem:[#allocation2 + $0x30] sm:$0xff] %v2462_v50  ;;  %v1316_v51 = vpop.f32.mrb[19].mxu1 }
 0x2df   : > { %1387 = vst [vmem:[#allocation2 + $0x20] sm:$0xff] %v1316_v51 }
 0x2e5   : > { %v2465_v52 = vpop.f32.mrb[20].mxu1 }
 0x2e6   : > { %1390 = vst [vmem:[#allocation2 + $0x50] sm:$0xff] %v2465_v52  ;;  %v1326_v53 = vpop.f32.mrb[21].mxu1 }
 0x2e7   : > { %1389 = vst [vmem:[#allocation2 + $0x40] sm:$0xff] %v1326_v53 }
 0x2ed   : > { %v2468_v54 = vpop.f32.mrb[22].mxu1 }
 0x2ee   : > { %1392 = vst [vmem:[#allocation2 + $0x70] sm:$0xff] %v2468_v54  ;;  %v1336_v55 = vpop.f32.mrb[23].mxu1 }
 0x2ef   : > { %1391 = vst [vmem:[#allocation2 + $0x60] sm:$0xff] %v1336_v55 }
 0x2f5   : > { %v2471_v57 = vpop.f32.mrb[24].mxu1 }
 0x2f6   : > { %1394 = vst [vmem:[#allocation2 + $0x90] sm:$0xff] %v2471_v57  ;;  %v1346_v58 = vpop.f32.mrb[25].mxu1 }
 0x2f7   : > { %1393 = vst [vmem:[#allocation2 + $0x80] sm:$0xff] %v1346_v58 }
 0x2fd   : > { %v2474_v59 = vpop.f32.mrb[26].mxu1 }
 0x2fe   : > { %1396 = vst [vmem:[#allocation2 + $0xb0] sm:$0xff] %v2474_v59  ;;  %v1356_v61 = vpop.f32.mrb[27].mxu1 }
 0x2ff   : > { %1395 = vst [vmem:[#allocation2 + $0xa0] sm:$0xff] %v1356_v61 }
 0x305   : > { %v2477_v63 = vpop.f32.mrb[28].mxu1 }
 0x306   : > { %1398 = vst [vmem:[#allocation2 + $0xd0] sm:$0xff] %v2477_v63  ;;  %v1366_v0 = vpop.f32.mrb[29].mxu1 }
 0x307   : > { %1397 = vst [vmem:[#allocation2 + $0xc0] sm:$0xff] %v1366_v0 }
 0x30d   : > { %v2480_v2 = vpop.f32.mrb[30].mxu1 }
 0x30e   : > { %1400 = vst [vmem:[#allocation2 + $0xf0] sm:$0xff] %v2480_v2  ;;  %v1376_v3 = vpop.f32.mrb[31].mxu1 }
 0x30f   : > { %1399 = vst [vmem:[#allocation2 + $0xe0] sm:$0xff] %v1376_v3 }
 0x311   : > { %v2515_v5 = vpop.f32.mrb[32].mxu1 }
 0x312   : > { %1563 = vst [vmem:[#allocation2 + $0x18] sm:$0xff] %v2515_v5  ;;  %v1483_v6 = vpop.f32.mrb[33].mxu1 }
 0x313   : > { %1562 = vst [vmem:[#allocation2 + $0x8] sm:$0xff] %v1483_v6 }
 0x315   : > { %v2518_v8 = vpop.f32.mrb[34].mxu1 }
 0x316   : > { %1565 = vst [vmem:[#allocation2 + $0x38] sm:$0xff] %v2518_v8  ;;  %v1493_v56 = vpop.f32.mrb[35].mxu1 }
 0x317   : > { %1564 = vst [vmem:[#allocation2 + $0x28] sm:$0xff] %v1493_v56 }
 0x319   : > { %v2521_v9 = vpop.f32.mrb[36].mxu1 }
 0x31a   : > { %1567 = vst [vmem:[#allocation2 + $0x58] sm:$0xff] %v2521_v9  ;;  %v1503_v10 = vpop.f32.mrb[37].mxu1 }
 0x31b   : > { %1566 = vst [vmem:[#allocation2 + $0x48] sm:$0xff] %v1503_v10 }
 0x31d   : > { %v2524_v11 = vpop.f32.mrb[38].mxu1 }
 0x31e   : > { %1569 = vst [vmem:[#allocation2 + $0x78] sm:$0xff] %v2524_v11  ;;  %v1513_v12 = vpop.f32.mrb[39].mxu1 }
 0x31f   : > { %1568 = vst [vmem:[#allocation2 + $0x68] sm:$0xff] %v1513_v12 }
 0x321   : > { %v2527_v13 = vpop.f32.mrb[40].mxu1 }
 0x322   : > { %1571 = vst [vmem:[#allocation2 + $0x98] sm:$0xff] %v2527_v13  ;;  %v1523_v14 = vpop.f32.mrb[41].mxu1 }
 0x323   : > { %1570 = vst [vmem:[#allocation2 + $0x88] sm:$0xff] %v1523_v14 }
 0x325   : > { %v2530_v16 = vpop.f32.mrb[42].mxu1 }
 0x326   : > { %1573 = vst [vmem:[#allocation2 + $0xb8] sm:$0xff] %v2530_v16  ;;  %v1533_v19 = vpop.f32.mrb[43].mxu1 }
 0x327   : > { %1572 = vst [vmem:[#allocation2 + $0xa8] sm:$0xff] %v1533_v19 }
 0x329   : > { %v2533_v21 = vpop.f32.mrb[44].mxu1 }
 0x32a   : > { %1575 = vst [vmem:[#allocation2 + $0xd8] sm:$0xff] %v2533_v21  ;;  %v1543_v22 = vpop.f32.mrb[45].mxu1 }
 0x32b   : > { %1574 = vst [vmem:[#allocation2 + $0xc8] sm:$0xff] %v1543_v22 }
 0x32d   : > { %v2536_v24 = vpop.f32.mrb[46].mxu1 }
 0x32e   : > { %1577 = vst [vmem:[#allocation2 + $0xf8] sm:$0xff] %v2536_v24  ;;  %v1553_v15 = vpop.f32.mrb[47].mxu1 }
 0x32f   : > { %1576 = vst [vmem:[#allocation2 + $0xe8] sm:$0xff] %v1553_v15 }
 0x330 PF: > { %p2172_p5 = scmp.ne.s32.totalorder %s2737_s21, 1 }
 0x331   : > { %v1605_v25 = vld [vmem:[#allocation2 + $0x8] sm:$0xff] (!%p2172_p5)  ;;  %v1607_v26 = vld [vmem:[#allocation2 + $0x18] sm:$0xff] (!%p2172_p5)  ;;  %v1604_v27 = vld [vmem:[#allocation2] sm:$0xff] (!%p2172_p5)  ;;  %v2748_v33 = vmov (!%p2172_p5), 0   ;;  %v1986_v14 = vlaneseq (!%p2172_p5) }
 0x332   : > { %1581 = sbr.rel (%p2172_p5) target bundleno = 1094 (0x446), region = 68  ;;  %v1637_v29 = vpack.c.bf16 (!%p2172_p5), %v1607_v26, %v1605_v25  ;;  %v1606_v17 = vld [vmem:[#allocation2 + $0x10] sm:$0xff] (!%p2172_p5)  ;;  %v1609_v30 = vld [vmem:[#allocation2 + $0x28] sm:$0xff] (!%p2172_p5)  ;;  %v1611_v32 = vld [vmem:[#allocation2 + $0x38] sm:$0xff] (!%p2172_p5)  ;;  %1732 = vmatprep.mubr.bf16.mxu0 (!%p2172_p5), %v2748_v33  ;;  %1772 = vmatprep.mubr.bf16.mxu1 (!%p2172_p5), %v2748_v33 }
 0x333   : > { %v1636_v20 = vpack.c.bf16 (!%p2172_p5), %v1606_v17, %v1604_v27  ;;  %v1639_v18 = vpack.c.bf16 (!%p2172_p5), %v1611_v32, %v1609_v30  ;;  %v1608_v34 = vld [vmem:[#allocation2 + $0x20] sm:$0xff] (!%p2172_p5)  ;;  %v1610_v60 = vld [vmem:[#allocation2 + $0x30] sm:$0xff] (!%p2172_p5)  ;;  %v1613_v23 = vld [vmem:[#allocation2 + $0x48] sm:$0xff] (!%p2172_p5)  ;;  %v1987_v16 = vshrl.u32 (!%p2172_p5), %v1986_v14, 7 }
 0x334   : > { %1700 = vmatprep.subr.bf16.mxu0 (!%p2172_p5), %v1637_v29  ;;  %2665 = vmatprep.subr.bf16.mxu1 (!%p2172_p5), %v1637_v29  ;;  %v1615_v28 = vld [vmem:[#allocation2 + $0x58] sm:$0xff] (!%p2172_p5)  ;;  %v1638_v36 = vpack.c.bf16 (!%p2172_p5), %v1610_v60, %v1608_v34  ;;  %v1612_v31 = vld [vmem:[#allocation2 + $0x40] sm:$0xff] (!%p2172_p5)  ;;  %v1614_v35 = vld [vmem:[#allocation2 + $0x50] sm:$0xff] (!%p2172_p5) }
 0x335   : > { %1701 = vmatpush1.bf16.msra.mxu0 (!%p2172_p5), %v1636_v20  ;;  %2673 = vmatpush1.bf16.msra.mxu1 (!%p2172_p5), %v1636_v20  ;;  %v1641_v37 = vpack.c.bf16 (!%p2172_p5), %v1615_v28, %v1613_v23  ;;  %v1617_v39 = vld [vmem:[#allocation2 + $0x68] sm:$0xff] (!%p2172_p5)  ;;  %v1619_v62 = vld [vmem:[#allocation2 + $0x78] sm:$0xff] (!%p2172_p5)  ;;  %v1640_v38 = vpack.c.bf16 (!%p2172_p5), %v1614_v35, %v1612_v31  ;;  %v1616_v1 = vld [vmem:[#allocation2 + $0x60] sm:$0xff] (!%p2172_p5)  ;;  %v1988_v19 = vsub.s32 (!%p2172_p5), 0, %v1987_v16  ;;  %v1992_v22 = vsub.s32 (!%p2172_p5), 1, %v1987_v16 }
 0x336   : > { %1702 = vmatprep.subr.bf16.mxu0 (!%p2172_p5), %v1639_v18  ;;  %2666 = vmatprep.subr.bf16.mxu1 (!%p2172_p5), %v1639_v18  ;;  %v1643_v40 = vpack.c.bf16 (!%p2172_p5), %v1619_v62, %v1617_v39  ;;  %v1618_v41 = vld [vmem:[#allocation2 + $0x70] sm:$0xff] (!%p2172_p5)  ;;  %v1621_v42 = vld [vmem:[#allocation2 + $0x88] sm:$0xff] (!%p2172_p5)  ;;  %v1623_v43 = vld [vmem:[#allocation2 + $0x98] sm:$0xff] (!%p2172_p5) }
 0x337   : > { %v1620_v44 = vld [vmem:[#allocation2 + $0x80] sm:$0xff] (!%p2172_p5)  ;;  %v1642_v45 = vpack.c.bf16 (!%p2172_p5), %v1618_v41, %v1616_v1  ;;  %v1622_v4 = vld [vmem:[#allocation2 + $0x90] sm:$0xff] (!%p2172_p5)  ;;  %v1645_v46 = vpack.c.bf16 (!%p2172_p5), %v1623_v43, %v1621_v42  ;;  %v1625_v7 = vld [vmem:[#allocation2 + $0xa8] sm:$0xff] (!%p2172_p5) }
 0x338   : > { %v1627_v47 = vld [vmem:[#allocation2 + $0xb8] sm:$0xff] (!%p2172_p5)  ;;  %v1644_v48 = vpack.c.bf16 (!%p2172_p5), %v1622_v4, %v1620_v44  ;;  %v1624_v49 = vld [vmem:[#allocation2 + $0xa0] sm:$0xff] (!%p2172_p5)  ;;  %v1626_v51 = vld [vmem:[#allocation2 + $0xb0] sm:$0xff] (!%p2172_p5) }
 0x339   : > { %1703 = vmatpush1.bf16.msra.mxu0 %v1638_v36  ;;  %2674 = vmatpush1.bf16.msra.mxu1 %v1638_v36  ;;  %v1647_v50 = vpack.c.bf16 %v1627_v47, %v1625_v7  ;;  %v1629_v52 = vld [vmem:[#allocation2 + $0xc8] sm:$0xff]  ;;  %v1631_v53 = vld [vmem:[#allocation2 + $0xd8] sm:$0xff]  ;;  %v1646_v54 = vpack.c.bf16 %v1626_v51, %v1624_v49  ;;  %v1628_v57 = vld [vmem:[#allocation2 + $0xc0] sm:$0xff] }
 0x33a   : > { %1704 = vmatprep.subr.bf16.mxu0 %v1641_v37  ;;  %2667 = vmatprep.subr.bf16.mxu1 %v1641_v37  ;;  %v1649_v55 = vpack.c.bf16 %v1631_v53, %v1629_v52  ;;  %v1630_v58 = vld [vmem:[#allocation2 + $0xd0] sm:$0xff]  ;;  %v1633_v59 = vld [vmem:[#allocation2 + $0xe8] sm:$0xff]  ;;  %v1635_v61 = vld [vmem:[#allocation2 + $0xf8] sm:$0xff] }
 0x33b   : > { %v1648_v63 = vpack.c.bf16 %v1630_v58, %v1628_v57  ;;  %v1651_v0 = vpack.c.bf16 %v1635_v61, %v1633_v59  ;;  %v1632_v2 = vld [vmem:[#allocation2 + $0xe0] sm:$0xff]  ;;  %v1634_v3 = vld [vmem:[#allocation2 + $0xf0] sm:$0xff]  ;;  %v2717_v56 = vld [vmem:[%s3313_s0 + $0x8] sm:$0xff]  }
 0x33c   : > { %v1650_v5 = vpack.c.bf16 %v1634_v3, %v1632_v2  ;;  %v2715_v6 = vld [vmem:[%s3313_s0] sm:$0xff]   ;;  %v2718_v9 = vld [vmem:[%s3313_s0 + $0x28] sm:$0xff]   ;;  %v2719_v10 = vld [vmem:[%s3313_s0 + $0x10] sm:$0xff]  }
 0x33d   : > { %1705 = vmatpush1.bf16.msra.mxu0 %v1640_v38  ;;  %2675 = vmatpush1.bf16.msra.mxu1 %v1640_v38  ;;  %v2716_v8 = vld [vmem:[%s3313_s0 + $0x20] sm:$0xff]   ;;  %v2720_v11 = vld [vmem:[%s3313_s0 + $0x30] sm:$0xff]   ;;  %v2721_v12 = vld [vmem:[%s3313_s0 + $0x18] sm:$0xff]  }
 0x33e   : > { %1706 = vmatprep.subr.bf16.mxu0 %v1643_v40  ;;  %2668 = vmatprep.subr.bf16.mxu1 %v1643_v40  ;;  %v2722_v13 = vld [vmem:[%s3313_s0 + $0x38] sm:$0xff]   ;;  %v1984_v21 = vld [vmem:[%s3318_s5] sm:$0x3] }
 0x33f   : > { %v3172_v24 = vrot.slane %v1984_v21, %v1988_v19  ;;  %v3174_v15 = vrot.slane %v1984_v21, %v1992_v22 }
 0x341   : > { %1707 = vmatpush1.bf16.msra.mxu0 %v1642_v45  ;;  %2676 = vmatpush1.bf16.msra.mxu1 %v1642_v45 }
 0x342   : > { %1708 = vmatprep.subr.bf16.mxu0 %v1645_v46  ;;  %2669 = vmatprep.subr.bf16.mxu1 %v1645_v46 }
 0x345   : > { %1709 = vmatpush1.bf16.msra.mxu0 %v1644_v48  ;;  %2677 = vmatpush1.bf16.msra.mxu1 %v1644_v48 }
 0x346   : > { %1710 = vmatprep.subr.bf16.mxu0 %v1647_v50  ;;  %2670 = vmatprep.subr.bf16.mxu1 %v1647_v50 }
 0x349   : > { %1711 = vmatpush1.bf16.msra.mxu0 %v1646_v54  ;;  %2678 = vmatpush1.bf16.msra.mxu1 %v1646_v54 }
 0x34a   : > { %1712 = vmatprep.subr.bf16.mxu0 %v1649_v55  ;;  %2671 = vmatprep.subr.bf16.mxu1 %v1649_v55 }
 0x34d   : > { %1713 = vmatpush1.bf16.msra.mxu0 %v1648_v63  ;;  %2679 = vmatpush1.bf16.msra.mxu1 %v1648_v63 }
 0x34e   : > { %1714 = vmatprep.subr.bf16.mxu0 %v1651_v0  ;;  %2672 = vmatprep.subr.bf16.mxu1 %v1651_v0 }
 0x351   : > { %1715 = vmatpush1.bf16.msra.mxu0 %v1650_v5  ;;  %2680 = vmatpush1.bf16.msra.mxu1 %v1650_v5 }
 0x354   : > { %1733 = vmatmul.mubr.bf16.vlgmr.msra.gmra.mrb[0].mxu0 %v2715_v6  ;;  %1773 = vmatmul.mubr.bf16.vlgmr.msra.gmra.mrb[0].mxu1 %v2716_v8 }
 0x355   : > { %1742 = vmatprep.mubr.bf16.mxu0 %v2748_v33  ;;  %1782 = vmatprep.mubr.bf16.mxu1 %v2748_v33 }
 0x35c   : > { %1743 = vmatmul.mubr.bf16.gmra.mrb[4].mxu0 %v2717_v56  ;;  %1783 = vmatmul.mubr.bf16.gmra.mrb[4].mxu1 %v2718_v9 }
 0x35d   : > { %1752 = vmatprep.mubr.bf16.mxu0 %v2748_v33  ;;  %1792 = vmatprep.mubr.bf16.mxu1 %v2748_v33 }
 0x364   : > { %1753 = vmatmul.mubr.bf16.gmra.mrb[8].mxu0 %v2719_v10  ;;  %1793 = vmatmul.mubr.bf16.gmra.mrb[8].mxu1 %v2720_v11 }
 0x365   : > { %1762 = vmatprep.mubr.bf16.mxu0 %v2748_v33  ;;  %1802 = vmatprep.mubr.bf16.mxu1 %v2748_v33 }
 0x36c   : > { %1763 = vmatmul.mubr.bf16.gmra.mrb[12].mxu0 %v2721_v12  ;;  %1803 = vmatmul.mubr.bf16.gmra.mrb[12].mxu1 %v2722_v13 }
 0x427   : > { %v1734_v25 = vpop.f32.mrb[0].mxu0  ;;  %v1774_v26 = vpop.f32.mrb[0].mxu1 }
 0x428   : > { %v1996_v27 = vadd.f32 %v3172_v24, %v1734_v25  ;;  %v2012_v29 = vadd.f32 %v3172_v24, %v1774_v26  ;;  %v1736_v17 = vpop.f32.mrb[1].mxu0  ;;  %v1776_v30 = vpop.f32.mrb[1].mxu1 }
 0x429   : > { %v1997_v32 = vadd.f32 %v3174_v15, %v1736_v17  ;;  %v2013_v33 = vadd.f32 %v3174_v15, %v1776_v30  ;;  %v1738_v20 = vpop.f32.mrb[2].mxu0  ;;  %v1778_v18 = vpop.f32.mrb[2].mxu1 }
 0x42a   : > { %2028 = vst [vmem:[%s3319_s6] sm:$0xff] %v1996_v27  ;;  %2044 = vst [vmem:[%s3319_s6 + $0x80] sm:$0xff] %v2012_v29  ;;  %v1998_v34 = vadd.f32 %v3172_v24, %v1738_v20  ;;  %v2014_v60 = vadd.f32 %v3172_v24, %v1778_v18  ;;  %v1740_v23 = vpop.f32.mrb[3].mxu0  ;;  %v1780_v28 = vpop.f32.mrb[3].mxu1 }
 0x42b   : > { %2029 = vst [vmem:[%s3319_s6 + $0x8] sm:$0xff] %v1997_v32  ;;  %2045 = vst [vmem:[%s3319_s6 + $0x88] sm:$0xff] %v2013_v33  ;;  %v1999_v36 = vadd.f32 %v3174_v15, %v1740_v23  ;;  %v2015_v37 = vadd.f32 %v3174_v15, %v1780_v28 }
 0x42c   : > { %2030 = vst [vmem:[%s3319_s6 + $0x10] sm:$0xff] %v1998_v34  ;;  %2046 = vst [vmem:[%s3319_s6 + $0x90] sm:$0xff] %v2014_v60 }
 0x42d   : > { %2031 = vst [vmem:[%s3319_s6 + $0x18] sm:$0xff] %v1999_v36  ;;  %2047 = vst [vmem:[%s3319_s6 + $0x98] sm:$0xff] %v2015_v37 }
 0x42f   : > { %v1744_v31 = vpop.f32.mrb[4].mxu0  ;;  %v1784_v35 = vpop.f32.mrb[4].mxu1 }
 0x430   : > { %v2000_v39 = vadd.f32 %v3172_v24, %v1744_v31  ;;  %v2016_v62 = vadd.f32 %v3172_v24, %v1784_v35  ;;  %v1746_v38 = vpop.f32.mrb[5].mxu0  ;;  %v1786_v40 = vpop.f32.mrb[5].mxu1 }
 0x431   : > { %v2001_v1 = vadd.f32 %v3174_v15, %v1746_v38  ;;  %v2017_v41 = vadd.f32 %v3174_v15, %v1786_v40  ;;  %v1748_v42 = vpop.f32.mrb[6].mxu0  ;;  %v1788_v43 = vpop.f32.mrb[6].mxu1 }
 0x432   : > { %2032 = vst [vmem:[%s3319_s6 + $0x20] sm:$0xff] %v2000_v39  ;;  %2048 = vst [vmem:[%s3319_s6 + $0xa0] sm:$0xff] %v2016_v62  ;;  %v2002_v44 = vadd.f32 %v3172_v24, %v1748_v42  ;;  %v2018_v45 = vadd.f32 %v3172_v24, %v1788_v43  ;;  %v1750_v4 = vpop.f32.mrb[7].mxu0  ;;  %v1790_v46 = vpop.f32.mrb[7].mxu1 }
 0x433   : > { %2033 = vst [vmem:[%s3319_s6 + $0x28] sm:$0xff] %v2001_v1  ;;  %2049 = vst [vmem:[%s3319_s6 + $0xa8] sm:$0xff] %v2017_v41  ;;  %v2003_v7 = vadd.f32 %v3174_v15, %v1750_v4  ;;  %v2019_v47 = vadd.f32 %v3174_v15, %v1790_v46 }
 0x434   : > { %2034 = vst [vmem:[%s3319_s6 + $0x30] sm:$0xff] %v2002_v44  ;;  %2050 = vst [vmem:[%s3319_s6 + $0xb0] sm:$0xff] %v2018_v45 }
 0x435   : > { %2035 = vst [vmem:[%s3319_s6 + $0x38] sm:$0xff] %v2003_v7  ;;  %2051 = vst [vmem:[%s3319_s6 + $0xb8] sm:$0xff] %v2019_v47 }
 0x437   : > { %v1754_v48 = vpop.f32.mrb[8].mxu0  ;;  %v1794_v49 = vpop.f32.mrb[8].mxu1 }
 0x438   : > { %v2004_v50 = vadd.f32 %v3172_v24, %v1754_v48  ;;  %v2020_v51 = vadd.f32 %v3172_v24, %v1794_v49  ;;  %v1756_v52 = vpop.f32.mrb[9].mxu0  ;;  %v1796_v53 = vpop.f32.mrb[9].mxu1 }
 0x439   : > { %v2005_v54 = vadd.f32 %v3174_v15, %v1756_v52  ;;  %v2021_v55 = vadd.f32 %v3174_v15, %v1796_v53  ;;  %v1758_v57 = vpop.f32.mrb[10].mxu0  ;;  %v1798_v58 = vpop.f32.mrb[10].mxu1 }
 0x43a   : > { %2036 = vst [vmem:[%s3319_s6 + $0x40] sm:$0xff] %v2004_v50  ;;  %2052 = vst [vmem:[%s3319_s6 + $0xc0] sm:$0xff] %v2020_v51  ;;  %v2006_v59 = vadd.f32 %v3172_v24, %v1758_v57  ;;  %v2022_v61 = vadd.f32 %v3172_v24, %v1798_v58  ;;  %v1760_v63 = vpop.f32.mrb[11].mxu0  ;;  %v1800_v0 = vpop.f32.mrb[11].mxu1 }
 0x43b   : > { %2037 = vst [vmem:[%s3319_s6 + $0x48] sm:$0xff] %v2005_v54  ;;  %2053 = vst [vmem:[%s3319_s6 + $0xc8] sm:$0xff] %v2021_v55  ;;  %v2007_v2 = vadd.f32 %v3174_v15, %v1760_v63  ;;  %v2023_v3 = vadd.f32 %v3174_v15, %v1800_v0 }
 0x43c   : > { %2038 = vst [vmem:[%s3319_s6 + $0x50] sm:$0xff] %v2006_v59  ;;  %2054 = vst [vmem:[%s3319_s6 + $0xd0] sm:$0xff] %v2022_v61 }
 0x43d   : > { %2039 = vst [vmem:[%s3319_s6 + $0x58] sm:$0xff] %v2007_v2  ;;  %2055 = vst [vmem:[%s3319_s6 + $0xd8] sm:$0xff] %v2023_v3 }
 0x43f   : > { %v1764_v5 = vpop.f32.mrb[12].mxu0  ;;  %v1804_v6 = vpop.f32.mrb[12].mxu1 }
 0x440   : > { %v2008_v8 = vadd.f32 %v3172_v24, %v1764_v5  ;;  %v2024_v56 = vadd.f32 %v3172_v24, %v1804_v6  ;;  %v1766_v9 = vpop.f32.mrb[13].mxu0  ;;  %v1806_v10 = vpop.f32.mrb[13].mxu1 }
 0x441   : > { %v2009_v11 = vadd.f32 %v3174_v15, %v1766_v9  ;;  %v2025_v12 = vadd.f32 %v3174_v15, %v1806_v10  ;;  %v1768_v13 = vpop.f32.mrb[14].mxu0  ;;  %v1808_v14 = vpop.f32.mrb[14].mxu1 }
 0x442   : > { %2040 = vst [vmem:[%s3319_s6 + $0x60] sm:$0xff] %v2008_v8  ;;  %2056 = vst [vmem:[%s3319_s6 + $0xe0] sm:$0xff] %v2024_v56  ;;  %v2010_v16 = vadd.f32 %v3172_v24, %v1768_v13  ;;  %v2026_v19 = vadd.f32 %v3172_v24, %v1808_v14  ;;  %v1770_v21 = vpop.f32.mrb[15].mxu0  ;;  %v1810_v22 = vpop.f32.mrb[15].mxu1 }
 0x443   : > { %2041 = vst [vmem:[%s3319_s6 + $0x68] sm:$0xff] %v2009_v11  ;;  %2057 = vst [vmem:[%s3319_s6 + $0xe8] sm:$0xff] %v2025_v12  ;;  %v2011_v25 = vadd.f32 %v3174_v15, %v1770_v21  ;;  %v2027_v26 = vadd.f32 %v3174_v15, %v1810_v22 }
 0x444   : > { %2042 = vst [vmem:[%s3319_s6 + $0x70] sm:$0xff] %v2010_v16  ;;  %2058 = vst [vmem:[%s3319_s6 + $0xf0] sm:$0xff] %v2026_v19 }
 0x445   : > { %2043 = vst [vmem:[%s3319_s6 + $0x78] sm:$0xff] %v2011_v25  ;;  %2059 = vst [vmem:[%s3319_s6 + $0xf8] sm:$0xff] %v2027_v26 }
 0x446 PF: > { %s16_s23 = sadd.s32 1, %s2745_s23   ;;  %s3320_s21 = smov %s2741_s22 }
 0x447   : > { %p13_p6 = scmp.ge.s32.totalorder %s16_s23, 4   ;;  %s3321_s22 = smov %s3323_s24 }
 0x449   :  { %15 = sbr.rel (!%p13_p6) target bundleno = 2 (0x2), region = 117 }

</bundles_post_ra>
